<compile_context>
chip_gen: v7x
topology: tpu7x:2x2x1
jax: 0.10.0
libtpu: 0.0.40
codegen_flags: <defaults>
</compile_context>

<pallas_src>
import functools

import jax
import jax.numpy as jnp
from jax.experimental import pallas as pl
from jax.experimental.pallas import tpu as pltpu

LN_EPS = 1e-12  # TF-style LayerNorm: eps inside the sqrt.


def _layer_norm(x, w, b):
    # float32 layer norm, eps inside sqrt (matches the custom LayerNorm).
    u = jnp.mean(x, axis=-1, keepdims=True)
    s = jnp.mean((x - u) ** 2, axis=-1, keepdims=True)
    xn = (x - u) / jnp.sqrt(s + LN_EPS)
    return w * xn + b


def resblock_kernel(
    x_ref, kpm_ref,
    ln1w_ref, ln1b_ref,
    wqkv_ref, bqkv_ref,
    wo_ref, bo_ref,
    ln2w_ref, ln2b_ref,
    wfc_ref, bfc_ref,
    wproj_ref, bproj_ref,
    o_ref,
    *, num_heads, head_dim,
):
    x = x_ref[0]                                 # (L, W) float32
    L, W = x.shape

    # ---------------- attention branch: x + MHA(LN1(x)) ----------------
    h = _layer_norm(x, ln1w_ref[...], ln1b_ref[...])                       # f32
    qkv = jnp.dot(h.astype(jnp.bfloat16), wqkv_ref[...],
                  preferred_element_type=jnp.float32) + bqkv_ref[...]      # (L, 3W) f32
    # NOTE: 1/sqrt(head_dim) is already folded into the Q columns of wqkv/bqkv.

    def split_heads(offset):
        # (L, W) lane slices -> (H, L, hd) head-major stack (major-dim concat).
        return jnp.stack(
            [qkv[:, offset + i * head_dim: offset + (i + 1) * head_dim]
             for i in range(num_heads)], axis=0)

    q = split_heads(0).astype(jnp.bfloat16)      # (H, L, hd)
    k = split_heads(W).astype(jnp.bfloat16)
    v = split_heads(2 * W).astype(jnp.bfloat16)

    kpm_bias = kpm_ref[0]                        # (1, L): 0 valid / -1e30 padded
    s = jnp.einsum('hqd,hkd->hqk', q, k,
                   preferred_element_type=jnp.float32)                     # (H, L, L) f32
    s = s + kpm_bias                             # broadcast over heads & queries
    m = jnp.max(s, axis=-1, keepdims=True)
    p = jnp.exp(s - m)                           # f32 softmax
    denom = jnp.sum(p, axis=-1, keepdims=True)
    p = p * pl.reciprocal(denom, approx=True)    # EUP reciprocal (free slot)
    ctx = jnp.einsum('hqk,hkd->hqd', p.astype(jnp.bfloat16), v,
                     preferred_element_type=jnp.float32)                   # (H, L, hd) f32
    attn = jnp.concatenate([ctx[i] for i in range(num_heads)], axis=-1)    # (L, W)
    attn = jnp.dot(attn.astype(jnp.bfloat16), wo_ref[...],
                   preferred_element_type=jnp.float32) + bo_ref[...]
    x = x + attn

    # ---------------- MLP branch: x + c_proj(QuickGELU(c_fc(LN2(x)))) ----
    h2 = _layer_norm(x, ln2w_ref[...], ln2b_ref[...])
    hid = jnp.dot(h2.astype(jnp.bfloat16), wfc_ref[...],
                  preferred_element_type=jnp.float32) + bfc_ref[...]       # (L, 4W) f32
    hid = hid * jax.nn.sigmoid(1.702 * hid)      # QuickGELU in f32 (v5e-safe)
    mlp = jnp.dot(hid.astype(jnp.bfloat16), wproj_ref[...],
                  preferred_element_type=jnp.float32) + bproj_ref[...]
    o_ref[0] = x + mlp


def _rep_spec(shape):
    # Whole-array (replicated) block; constant block index => stays VMEM-resident.
    return pl.BlockSpec(shape, lambda b, _n=len(shape): (0,) * _n)


def residual_attention_block(x, key_padding_mask, blk, num_heads):
    """x: (B, L, W) float32; key_padding_mask: (B, L) bool, True = padded key."""
    B, L, W = x.shape
    head_dim = W // num_heads
    # True positions get -inf on key logits; use -1e30 so exp underflows to 0
    # exactly without inf arithmetic inside Mosaic.
    kpm_bias = jnp.where(key_padding_mask, -1e30, 0.0).astype(jnp.float32)
    kpm_bias = kpm_bias[:, None, :]              # (B, 1, L)

    kernel = functools.partial(resblock_kernel,
                               num_heads=num_heads, head_dim=head_dim)
    return pl.pallas_call(
        kernel,
        out_shape=jax.ShapeDtypeStruct((B, L, W), jnp.float32),
        grid=(B,),
        in_specs=[
            pl.BlockSpec((1, L, W), lambda b: (b, 0, 0)),     # x
            pl.BlockSpec((1, 1, L), lambda b: (b, 0, 0)),     # key padding bias
            _rep_spec((1, W)), _rep_spec((1, W)),             # ln1 w, b (f32)
            _rep_spec((W, 3 * W)), _rep_spec((1, 3 * W)),     # in_proj  (bf16 W, f32 b)
            _rep_spec((W, W)), _rep_spec((1, W)),             # out_proj (bf16 W, f32 b)
            _rep_spec((1, W)), _rep_spec((1, W)),             # ln2 w, b (f32)
            _rep_spec((W, 4 * W)), _rep_spec((1, 4 * W)),     # c_fc     (bf16 W, f32 b)
            _rep_spec((4 * W, W)), _rep_spec((1, W)),         # c_proj   (bf16 W, f32 b)
        ],
        out_specs=pl.BlockSpec((1, L, W), lambda b: (b, 0, 0)),
        input_output_aliases={0: 0},             # residual output reuses x's buffer
        compiler_params=pltpu.CompilerParams(
            dimension_semantics=("parallel",),
            # Above the 16/32 MiB scoped defaults, below v7x's 64 MiB physical VMEM.
            vmem_limit_bytes=48 * 1024 * 1024,
        ),
    )(
        x, kpm_bias,
        blk["ln1_w"], blk["ln1_b"],
        blk["wqkv_t"], blk["bqkv"],
        blk["wo_t"], blk["bo"],
        blk["ln2_w"], blk["ln2_b"],
        blk["wfc_t"], blk["bfc"],
        blk["wproj_t"], blk["bproj"],
    )


def init_block_params(key, width, num_heads):
    """Synthetic weights; matmul weights pre-transposed to (in, out) and bf16."""
    std = 0.02
    k0, k1, k2, k3, k4 = jax.random.split(key, 5)
    head_dim = width // num_heads
    scale = 1.0 / (head_dim ** 0.5)

    wqkv_t = std * jax.random.normal(k0, (width, 3 * width), jnp.float32)
    bqkv = std * jax.random.normal(k4, (1, 3 * width), jnp.float32)
    # Fold the 1/sqrt(head_dim) query scale into the Q columns (weights + bias).
    wqkv_t = wqkv_t.at[:, :width].multiply(scale)
    bqkv = bqkv.at[:, :width].multiply(scale)

    return {
        "ln1_w": jnp.ones((1, width), jnp.float32),
        "ln1_b": jnp.zeros((1, width), jnp.float32),
        "wqkv_t": wqkv_t.astype(jnp.bfloat16),
        "bqkv": bqkv,
        "wo_t": (std * jax.random.normal(k1, (width, width), jnp.float32)
                 ).astype(jnp.bfloat16),
        "bo": jnp.zeros((1, width), jnp.float32),
        "ln2_w": jnp.ones((1, width), jnp.float32),
        "ln2_b": jnp.zeros((1, width), jnp.float32),
        "wfc_t": (std * jax.random.normal(k2, (width, 4 * width), jnp.float32)
                  ).astype(jnp.bfloat16),
        "bfc": jnp.zeros((1, 4 * width), jnp.float32),
        "wproj_t": (std * jax.random.normal(k3, (4 * width, width), jnp.float32)
                    ).astype(jnp.bfloat16),
        "bproj": jnp.zeros((1, width), jnp.float32),
    }


def resblock_reference(x, key_padding_mask, blk, num_heads):
    """Pure-JAX f32 reference of the same math (scale already folded in wqkv)."""
    B, L, W = x.shape
    hd = W // num_heads

    def ln(t, w, b):
        u = jnp.mean(t, -1, keepdims=True)
        s = jnp.mean((t - u) ** 2, -1, keepdims=True)
        return w * ((t - u) / jnp.sqrt(s + LN_EPS)) + b

    wqkv = blk["wqkv_t"].astype(jnp.float32)
    wo = blk["wo_t"].astype(jnp.float32)
    wfc = blk["wfc_t"].astype(jnp.float32)
    wproj = blk["wproj_t"].astype(jnp.float32)

    h = ln(x, blk["ln1_w"], blk["ln1_b"])
    qkv = h @ wqkv + blk["bqkv"]
    q, k, v = jnp.split(qkv, 3, axis=-1)
    q = q.reshape(B, L, num_heads, hd).transpose(0, 2, 1, 3)
    k = k.reshape(B, L, num_heads, hd).transpose(0, 2, 1, 3)
    v = v.reshape(B, L, num_heads, hd).transpose(0, 2, 1, 3)
    s = jnp.einsum('bhqd,bhkd->bhqk', q, k)
    s = s + jnp.where(key_padding_mask, -1e30, 0.0)[:, None, None, :]
    p = jax.nn.softmax(s, axis=-1)
    ctx = jnp.einsum('bhqk,bhkd->bhqd', p, v).transpose(0, 2, 1, 3).reshape(B, L, W)
    x = x + ctx @ wo + blk["bo"]
    h2 = ln(x, blk["ln2_w"], blk["ln2_b"])
    hid = h2 @ wfc + blk["bfc"]
    hid = hid * jax.nn.sigmoid(1.702 * hid)
    return x + hid @ wproj + blk["bproj"]


if __name__ == "__main__":
    # Small but lane-aligned config: d_model=128 (full 128-lane vreg), n_head=4.
    BATCH, SEQ, WIDTH, HEADS = 2, 8, 128, 4

    key = jax.random.PRNGKey(0)
    pkey, xkey = jax.random.split(key)
    blk = init_block_params(pkey, WIDTH, HEADS)

    x = 0.02 * jax.random.normal(xkey, (BATCH, SEQ, WIDTH), jnp.float32)
    # key_padding_mask: True => padded key position (ignored by attention).
    key_padding_mask = jnp.array(
        [[False, False, False, False, False, False, False, False],
         [False, False, False, False, False, True, True, True]])

    fwd = jax.jit(functools.partial(residual_attention_block, num_heads=HEADS))
    out = jax.block_until_ready(fwd(x, key_padding_mask, blk))

    assert out.shape == (BATCH, SEQ, WIDTH)
    assert bool(jnp.all(jnp.isfinite(out)))

    ref = resblock_reference(x, key_padding_mask, blk, HEADS)
    max_err = float(jnp.max(jnp.abs(out - ref)))
    assert max_err < 5e-2, f"max abs error vs f32 reference: {max_err}"
    print("KERNEL_OK")
</pallas_src>

<mosaic_0001>
module attributes {stable_mosaic.version = 11 : i64} {
  func.func @resblock_kernel(%arg0: i32, %arg1: memref<1x8x128xf32, #tpu.memory_space<vmem>>, %arg2: memref<1x1x8xf32, #tpu.memory_space<vmem>>, %arg3: memref<1x128xf32, #tpu.memory_space<vmem>>, %arg4: memref<1x128xf32, #tpu.memory_space<vmem>>, %arg5: memref<128x384xbf16, #tpu.memory_space<vmem>>, %arg6: memref<1x384xf32, #tpu.memory_space<vmem>>, %arg7: memref<128x128xbf16, #tpu.memory_space<vmem>>, %arg8: memref<1x128xf32, #tpu.memory_space<vmem>>, %arg9: memref<1x128xf32, #tpu.memory_space<vmem>>, %arg10: memref<1x128xf32, #tpu.memory_space<vmem>>, %arg11: memref<128x512xbf16, #tpu.memory_space<vmem>>, %arg12: memref<1x512xf32, #tpu.memory_space<vmem>>, %arg13: memref<512x128xbf16, #tpu.memory_space<vmem>>, %arg14: memref<1x128xf32, #tpu.memory_space<vmem>>, %arg15: memref<1x8x128xf32, #tpu.memory_space<vmem>>) attributes {dimension_semantics = [#tpu.dimension_semantics<parallel>], iteration_bounds = array<i64: 2>, scalar_prefetch = 0 : i64, scratch_operands = 0 : i64, tpu.core_type = #tpu.core_type<tc>, window_params = [{transform_indices = @transform_0, window_bounds = array<i64: 1, 8, 128>}, {transform_indices = @transform_1, window_bounds = array<i64: 1, 1, 8>}, {pipeline_mode = #tpu.pipeline_mode<synchronous>, transform_indices = @transform_2, window_bounds = array<i64: 1, 128>}, {pipeline_mode = #tpu.pipeline_mode<synchronous>, transform_indices = @transform_3, window_bounds = array<i64: 1, 128>}, {pipeline_mode = #tpu.pipeline_mode<synchronous>, transform_indices = @transform_4, window_bounds = array<i64: 128, 384>}, {pipeline_mode = #tpu.pipeline_mode<synchronous>, transform_indices = @transform_5, window_bounds = array<i64: 1, 384>}, {pipeline_mode = #tpu.pipeline_mode<synchronous>, transform_indices = @transform_6, window_bounds = array<i64: 128, 128>}, {pipeline_mode = #tpu.pipeline_mode<synchronous>, transform_indices = @transform_7, window_bounds = array<i64: 1, 128>}, {pipeline_mode = #tpu.pipeline_mode<synchronous>, transform_indices = @transform_8, window_bounds = array<i64: 1, 128>}, {pipeline_mode = #tpu.pipeline_mode<synchronous>, transform_indices = @transform_9, window_bounds = array<i64: 1, 128>}, {pipeline_mode = #tpu.pipeline_mode<synchronous>, transform_indices = @transform_10, window_bounds = array<i64: 128, 512>}, {pipeline_mode = #tpu.pipeline_mode<synchronous>, transform_indices = @transform_11, window_bounds = array<i64: 1, 512>}, {pipeline_mode = #tpu.pipeline_mode<synchronous>, transform_indices = @transform_12, window_bounds = array<i64: 512, 128>}, {pipeline_mode = #tpu.pipeline_mode<synchronous>, transform_indices = @transform_13, window_bounds = array<i64: 1, 128>}, {transform_indices = @transform_14, window_bounds = array<i64: 1, 8, 128>}]} {
    %c0 = arith.constant 0 : index
    %c0_0 = arith.constant 0 : index
    %c0_1 = arith.constant 0 : index
    %0 = vector.load %arg1[%c0, %c0_0, %c0_1] : memref<1x8x128xf32, #tpu.memory_space<vmem>>, vector<1x8x128xf32>
    %1 = vector.shape_cast %0 : vector<1x8x128xf32> to vector<8x128xf32>
    %c0_2 = arith.constant 0 : index
    %c0_3 = arith.constant 0 : index
    %2 = vector.load %arg3[%c0_2, %c0_3] : memref<1x128xf32, #tpu.memory_space<vmem>>, vector<1x128xf32>
    %c0_4 = arith.constant 0 : index
    %c0_5 = arith.constant 0 : index
    %3 = vector.load %arg4[%c0_4, %c0_5] : memref<1x128xf32, #tpu.memory_space<vmem>>, vector<1x128xf32>
    %cst = arith.constant dense<0.000000e+00> : vector<8xf32>
    %4 = vector.multi_reduction <add>, %1, %cst [1] : vector<8x128xf32> to vector<8xf32>
    %5 = vector.shape_cast %4 : vector<8xf32> to vector<8x1xf32>
    %cst_6 = arith.constant 1.280000e+02 : f32
    %6 = vector.broadcast %cst_6 : f32 to vector<8x1xf32>
    %7 = arith.divf %5, %6 : vector<8x1xf32>
    %8 = vector.broadcast %7 : vector<8x1xf32> to vector<8x128xf32>
    %9 = arith.subf %1, %8 : vector<8x128xf32>
    %10 = arith.mulf %9, %9 : vector<8x128xf32>
    %cst_7 = arith.constant dense<0.000000e+00> : vector<8xf32>
    %11 = vector.multi_reduction <add>, %10, %cst_7 [1] : vector<8x128xf32> to vector<8xf32>
    %12 = vector.shape_cast %11 : vector<8xf32> to vector<8x1xf32>
    %cst_8 = arith.constant 1.280000e+02 : f32
    %13 = vector.broadcast %cst_8 : f32 to vector<8x1xf32>
    %14 = arith.divf %12, %13 : vector<8x1xf32>
    %15 = vector.broadcast %7 : vector<8x1xf32> to vector<8x128xf32>
    %16 = arith.subf %1, %15 : vector<8x128xf32>
    %cst_9 = arith.constant 9.99999996E-13 : f32
    %17 = vector.broadcast %cst_9 : f32 to vector<8x1xf32>
    %18 = arith.addf %14, %17 : vector<8x1xf32>
    %19 = math.sqrt %18 : vector<8x1xf32>
    %20 = vector.broadcast %19 : vector<8x1xf32> to vector<8x128xf32>
    %21 = arith.divf %16, %20 : vector<8x128xf32>
    %22 = vector.broadcast %2 : vector<1x128xf32> to vector<8x128xf32>
    %23 = arith.mulf %22, %21 : vector<8x128xf32>
    %24 = vector.broadcast %3 : vector<1x128xf32> to vector<8x128xf32>
    %25 = arith.addf %23, %24 : vector<8x128xf32>
    %26 = arith.truncf %25 : vector<8x128xf32> to vector<8x128xbf16>
    %c0_10 = arith.constant 0 : index
    %c0_11 = arith.constant 0 : index
    %27 = vector.load %arg5[%c0_10, %c0_11] : memref<128x384xbf16, #tpu.memory_space<vmem>>, vector<128x384xbf16>
    %cst_12 = arith.constant dense<0.000000e+00> : vector<8x384xf32>
    %28 = tpu.matmul %26, %27, %cst_12 {dimension_numbers = #tpu.dot_dimension_numbers<[1], [0], [0], [1], [0, 0, 1, 1], [], []>} : vector<8x128xbf16>, vector<128x384xbf16>, vector<8x384xf32> -> vector<8x384xf32>
    %c0_13 = arith.constant 0 : index
    %c0_14 = arith.constant 0 : index
    %29 = vector.load %arg6[%c0_13, %c0_14] : memref<1x384xf32, #tpu.memory_space<vmem>>, vector<1x384xf32>
    %30 = vector.broadcast %29 : vector<1x384xf32> to vector<8x384xf32>
    %31 = arith.addf %28, %30 : vector<8x384xf32>
    %32 = vector.extract_strided_slice %31 {offsets = [0, 0], sizes = [8, 32], strides = [1, 1]} : vector<8x384xf32> to vector<8x32xf32>
    %33 = vector.extract_strided_slice %31 {offsets = [0, 32], sizes = [8, 32], strides = [1, 1]} : vector<8x384xf32> to vector<8x32xf32>
    %34 = vector.extract_strided_slice %31 {offsets = [0, 64], sizes = [8, 32], strides = [1, 1]} : vector<8x384xf32> to vector<8x32xf32>
    %35 = vector.extract_strided_slice %31 {offsets = [0, 96], sizes = [8, 32], strides = [1, 1]} : vector<8x384xf32> to vector<8x32xf32>
    %36 = vector.shape_cast %32 : vector<8x32xf32> to vector<1x8x32xf32>
    %37 = vector.shape_cast %33 : vector<8x32xf32> to vector<1x8x32xf32>
    %38 = vector.shape_cast %34 : vector<8x32xf32> to vector<1x8x32xf32>
    %39 = vector.shape_cast %35 : vector<8x32xf32> to vector<1x8x32xf32>
    %40 = tpu.concatenate %36, %37, %38, %39 in 0 : vector<1x8x32xf32>, vector<1x8x32xf32>, vector<1x8x32xf32>, vector<1x8x32xf32> -> vector<4x8x32xf32>
    %41 = arith.truncf %40 : vector<4x8x32xf32> to vector<4x8x32xbf16>
    %42 = vector.extract_strided_slice %31 {offsets = [0, 128], sizes = [8, 32], strides = [1, 1]} : vector<8x384xf32> to vector<8x32xf32>
    %43 = vector.extract_strided_slice %31 {offsets = [0, 160], sizes = [8, 32], strides = [1, 1]} : vector<8x384xf32> to vector<8x32xf32>
    %44 = vector.extract_strided_slice %31 {offsets = [0, 192], sizes = [8, 32], strides = [1, 1]} : vector<8x384xf32> to vector<8x32xf32>
    %45 = vector.extract_strided_slice %31 {offsets = [0, 224], sizes = [8, 32], strides = [1, 1]} : vector<8x384xf32> to vector<8x32xf32>
    %46 = vector.shape_cast %42 : vector<8x32xf32> to vector<1x8x32xf32>
    %47 = vector.shape_cast %43 : vector<8x32xf32> to vector<1x8x32xf32>
    %48 = vector.shape_cast %44 : vector<8x32xf32> to vector<1x8x32xf32>
    %49 = vector.shape_cast %45 : vector<8x32xf32> to vector<1x8x32xf32>
    %50 = tpu.concatenate %46, %47, %48, %49 in 0 : vector<1x8x32xf32>, vector<1x8x32xf32>, vector<1x8x32xf32>, vector<1x8x32xf32> -> vector<4x8x32xf32>
    %51 = arith.truncf %50 : vector<4x8x32xf32> to vector<4x8x32xbf16>
    %52 = vector.extract_strided_slice %31 {offsets = [0, 256], sizes = [8, 32], strides = [1, 1]} : vector<8x384xf32> to vector<8x32xf32>
    %53 = vector.extract_strided_slice %31 {offsets = [0, 288], sizes = [8, 32], strides = [1, 1]} : vector<8x384xf32> to vector<8x32xf32>
    %54 = vector.extract_strided_slice %31 {offsets = [0, 320], sizes = [8, 32], strides = [1, 1]} : vector<8x384xf32> to vector<8x32xf32>
    %55 = vector.extract_strided_slice %31 {offsets = [0, 352], sizes = [8, 32], strides = [1, 1]} : vector<8x384xf32> to vector<8x32xf32>
    %56 = vector.shape_cast %52 : vector<8x32xf32> to vector<1x8x32xf32>
    %57 = vector.shape_cast %53 : vector<8x32xf32> to vector<1x8x32xf32>
    %58 = vector.shape_cast %54 : vector<8x32xf32> to vector<1x8x32xf32>
    %59 = vector.shape_cast %55 : vector<8x32xf32> to vector<1x8x32xf32>
    %60 = tpu.concatenate %56, %57, %58, %59 in 0 : vector<1x8x32xf32>, vector<1x8x32xf32>, vector<1x8x32xf32>, vector<1x8x32xf32> -> vector<4x8x32xf32>
    %61 = arith.truncf %60 : vector<4x8x32xf32> to vector<4x8x32xbf16>
    %c0_15 = arith.constant 0 : index
    %c0_16 = arith.constant 0 : index
    %c0_17 = arith.constant 0 : index
    %62 = vector.load %arg2[%c0_15, %c0_16, %c0_17] : memref<1x1x8xf32, #tpu.memory_space<vmem>>, vector<1x1x8xf32>
    %63 = vector.shape_cast %62 : vector<1x1x8xf32> to vector<1x8xf32>
    "tpu.trace_start"() <{level = 10 : i32, message = "hqd,hkd->hqk"}> : () -> ()
    %cst_18 = arith.constant dense<0.000000e+00> : vector<4x8x8xf32>
    %64 = tpu.matmul %41, %51, %cst_18 {dimension_numbers = #tpu.dot_dimension_numbers<[2], [2], [1], [1], [0, 0, 0, 1, 1, 1], [0], [0]>} : vector<4x8x32xbf16>, vector<4x8x32xbf16>, vector<4x8x8xf32> -> vector<4x8x8xf32>
    "tpu.trace_stop"() : () -> ()
    %65 = vector.shape_cast %63 : vector<1x8xf32> to vector<1x1x8xf32>
    %66 = vector.broadcast %65 : vector<1x1x8xf32> to vector<4x8x8xf32>
    %67 = arith.addf %64, %66 : vector<4x8x8xf32>
    %cst_19 = arith.constant dense<0xFF800000> : vector<4x8xf32>
    %68 = vector.multi_reduction <maximumf>, %67, %cst_19 [2] : vector<4x8x8xf32> to vector<4x8xf32>
    %69 = vector.shape_cast %68 : vector<4x8xf32> to vector<4x8x1xf32>
    %70 = vector.broadcast %69 : vector<4x8x1xf32> to vector<4x8x8xf32>
    %71 = arith.subf %67, %70 : vector<4x8x8xf32>
    %72 = math.exp %71 : vector<4x8x8xf32>
    %cst_20 = arith.constant dense<0.000000e+00> : vector<4x8xf32>
    %73 = vector.multi_reduction <add>, %72, %cst_20 [2] : vector<4x8x8xf32> to vector<4x8xf32>
    %74 = vector.shape_cast %73 : vector<4x8xf32> to vector<4x8x1xf32>
    %75 = tpu.reciprocal %74 {approx = true} : vector<4x8x1xf32> -> vector<4x8x1xf32>
    %76 = vector.broadcast %75 : vector<4x8x1xf32> to vector<4x8x8xf32>
    %77 = arith.mulf %72, %76 : vector<4x8x8xf32>
    %78 = arith.truncf %77 : vector<4x8x8xf32> to vector<4x8x8xbf16>
    "tpu.trace_start"() <{level = 10 : i32, message = "hqk,hkd->hqd"}> : () -> ()
    %cst_21 = arith.constant dense<0.000000e+00> : vector<4x8x32xf32>
    %79 = tpu.matmul %78, %61, %cst_21 {dimension_numbers = #tpu.dot_dimension_numbers<[2], [1], [1], [2], [0, 0, 0, 1, 1, 2], [0], [0]>} : vector<4x8x8xbf16>, vector<4x8x32xbf16>, vector<4x8x32xf32> -> vector<4x8x32xf32>
    "tpu.trace_stop"() : () -> ()
    %80 = vector.extract_strided_slice %79 {offsets = [0, 0, 0], sizes = [1, 8, 32], strides = [1, 1, 1]} : vector<4x8x32xf32> to vector<1x8x32xf32>
    %81 = vector.shape_cast %80 : vector<1x8x32xf32> to vector<8x32xf32>
    %82 = vector.extract_strided_slice %79 {offsets = [1, 0, 0], sizes = [1, 8, 32], strides = [1, 1, 1]} : vector<4x8x32xf32> to vector<1x8x32xf32>
    %83 = vector.shape_cast %82 : vector<1x8x32xf32> to vector<8x32xf32>
    %84 = vector.extract_strided_slice %79 {offsets = [2, 0, 0], sizes = [1, 8, 32], strides = [1, 1, 1]} : vector<4x8x32xf32> to vector<1x8x32xf32>
    %85 = vector.shape_cast %84 : vector<1x8x32xf32> to vector<8x32xf32>
    %86 = vector.extract_strided_slice %79 {offsets = [3, 0, 0], sizes = [1, 8, 32], strides = [1, 1, 1]} : vector<4x8x32xf32> to vector<1x8x32xf32>
    %87 = vector.shape_cast %86 : vector<1x8x32xf32> to vector<8x32xf32>
    %88 = tpu.concatenate %81, %83, %85, %87 in 1 : vector<8x32xf32>, vector<8x32xf32>, vector<8x32xf32>, vector<8x32xf32> -> vector<8x128xf32>
    %89 = arith.truncf %88 : vector<8x128xf32> to vector<8x128xbf16>
    %c0_22 = arith.constant 0 : index
    %c0_23 = arith.constant 0 : index
    %90 = vector.load %arg7[%c0_22, %c0_23] : memref<128x128xbf16, #tpu.memory_space<vmem>>, vector<128x128xbf16>
    %cst_24 = arith.constant dense<0.000000e+00> : vector<8x128xf32>
    %91 = tpu.matmul %89, %90, %cst_24 {dimension_numbers = #tpu.dot_dimension_numbers<[1], [0], [0], [1], [0, 0, 1, 1], [], []>} : vector<8x128xbf16>, vector<128x128xbf16>, vector<8x128xf32> -> vector<8x128xf32>
    %c0_25 = arith.constant 0 : index
    %c0_26 = arith.constant 0 : index
    %92 = vector.load %arg8[%c0_25, %c0_26] : memref<1x128xf32, #tpu.memory_space<vmem>>, vector<1x128xf32>
    %93 = vector.broadcast %92 : vector<1x128xf32> to vector<8x128xf32>
    %94 = arith.addf %91, %93 : vector<8x128xf32>
    %95 = arith.addf %1, %94 : vector<8x128xf32>
    %c0_27 = arith.constant 0 : index
    %c0_28 = arith.constant 0 : index
    %96 = vector.load %arg9[%c0_27, %c0_28] : memref<1x128xf32, #tpu.memory_space<vmem>>, vector<1x128xf32>
    %c0_29 = arith.constant 0 : index
    %c0_30 = arith.constant 0 : index
    %97 = vector.load %arg10[%c0_29, %c0_30] : memref<1x128xf32, #tpu.memory_space<vmem>>, vector<1x128xf32>
    %cst_31 = arith.constant dense<0.000000e+00> : vector<8xf32>
    %98 = vector.multi_reduction <add>, %95, %cst_31 [1] : vector<8x128xf32> to vector<8xf32>
    %99 = vector.shape_cast %98 : vector<8xf32> to vector<8x1xf32>
    %cst_32 = arith.constant 1.280000e+02 : f32
    %100 = vector.broadcast %cst_32 : f32 to vector<8x1xf32>
    %101 = arith.divf %99, %100 : vector<8x1xf32>
    %102 = vector.broadcast %101 : vector<8x1xf32> to vector<8x128xf32>
    %103 = arith.subf %95, %102 : vector<8x128xf32>
    %104 = arith.mulf %103, %103 : vector<8x128xf32>
    %cst_33 = arith.constant dense<0.000000e+00> : vector<8xf32>
    %105 = vector.multi_reduction <add>, %104, %cst_33 [1] : vector<8x128xf32> to vector<8xf32>
    %106 = vector.shape_cast %105 : vector<8xf32> to vector<8x1xf32>
    %cst_34 = arith.constant 1.280000e+02 : f32
    %107 = vector.broadcast %cst_34 : f32 to vector<8x1xf32>
    %108 = arith.divf %106, %107 : vector<8x1xf32>
    %109 = vector.broadcast %101 : vector<8x1xf32> to vector<8x128xf32>
    %110 = arith.subf %95, %109 : vector<8x128xf32>
    %cst_35 = arith.constant 9.99999996E-13 : f32
    %111 = vector.broadcast %cst_35 : f32 to vector<8x1xf32>
    %112 = arith.addf %108, %111 : vector<8x1xf32>
    %113 = math.sqrt %112 : vector<8x1xf32>
    %114 = vector.broadcast %113 : vector<8x1xf32> to vector<8x128xf32>
    %115 = arith.divf %110, %114 : vector<8x128xf32>
    %116 = vector.broadcast %96 : vector<1x128xf32> to vector<8x128xf32>
    %117 = arith.mulf %116, %115 : vector<8x128xf32>
    %118 = vector.broadcast %97 : vector<1x128xf32> to vector<8x128xf32>
    %119 = arith.addf %117, %118 : vector<8x128xf32>
    %120 = arith.truncf %119 : vector<8x128xf32> to vector<8x128xbf16>
    %c0_36 = arith.constant 0 : index
    %c0_37 = arith.constant 0 : index
    %121 = vector.load %arg11[%c0_36, %c0_37] : memref<128x512xbf16, #tpu.memory_space<vmem>>, vector<128x512xbf16>
    %cst_38 = arith.constant dense<0.000000e+00> : vector<8x512xf32>
    %122 = tpu.matmul %120, %121, %cst_38 {dimension_numbers = #tpu.dot_dimension_numbers<[1], [0], [0], [1], [0, 0, 1, 1], [], []>} : vector<8x128xbf16>, vector<128x512xbf16>, vector<8x512xf32> -> vector<8x512xf32>
    %c0_39 = arith.constant 0 : index
    %c0_40 = arith.constant 0 : index
    %123 = vector.load %arg12[%c0_39, %c0_40] : memref<1x512xf32, #tpu.memory_space<vmem>>, vector<1x512xf32>
    %124 = vector.broadcast %123 : vector<1x512xf32> to vector<8x512xf32>
    %125 = arith.addf %122, %124 : vector<8x512xf32>
    %cst_41 = arith.constant 1.702000e+00 : f32
    %126 = vector.broadcast %cst_41 : f32 to vector<8x512xf32>
    %127 = arith.mulf %126, %125 : vector<8x512xf32>
    %128 = arith.negf %127 : vector<8x512xf32>
    %129 = math.exp %128 : vector<8x512xf32>
    %cst_42 = arith.constant 1.000000e+00 : f32
    %130 = vector.broadcast %cst_42 : f32 to vector<8x512xf32>
    %131 = arith.addf %130, %129 : vector<8x512xf32>
    %132 = arith.divf %130, %131 : vector<8x512xf32>
    %133 = arith.mulf %125, %132 : vector<8x512xf32>
    %134 = arith.truncf %133 : vector<8x512xf32> to vector<8x512xbf16>
    %c0_43 = arith.constant 0 : index
    %c0_44 = arith.constant 0 : index
    %135 = vector.load %arg13[%c0_43, %c0_44] : memref<512x128xbf16, #tpu.memory_space<vmem>>, vector<512x128xbf16>
    %cst_45 = arith.constant dense<0.000000e+00> : vector<8x128xf32>
    %136 = tpu.matmul %134, %135, %cst_45 {dimension_numbers = #tpu.dot_dimension_numbers<[1], [0], [0], [1], [0, 0, 1, 1], [], []>} : vector<8x512xbf16>, vector<512x128xbf16>, vector<8x128xf32> -> vector<8x128xf32>
    %c0_46 = arith.constant 0 : index
    %c0_47 = arith.constant 0 : index
    %137 = vector.load %arg14[%c0_46, %c0_47] : memref<1x128xf32, #tpu.memory_space<vmem>>, vector<1x128xf32>
    %138 = vector.broadcast %137 : vector<1x128xf32> to vector<8x128xf32>
    %139 = arith.addf %136, %138 : vector<8x128xf32>
    %140 = arith.addf %95, %139 : vector<8x128xf32>
    %c0_48 = arith.constant 0 : index
    %c0_49 = arith.constant 0 : index
    %c0_50 = arith.constant 0 : index
    %141 = vector.load %arg15[%c0_48, %c0_49, %c0_50] : memref<1x8x128xf32, #tpu.memory_space<vmem>>, vector<1x8x128xf32>
    %142 = vector.shape_cast %141 : vector<1x8x128xf32> to vector<8x128xf32>
    %143 = vector.shape_cast %140 : vector<8x128xf32> to vector<1x8x128xf32>
    tpu.vector_store %arg15[%c0_48, %c0_49, %c0_50], %143 {strides = array<i32>} : memref<1x8x128xf32, #tpu.memory_space<vmem>>, vector<1x8x128xf32>,
    return
  }
  func.func @transform_0(%arg0: i32) -> (i32, i32, i32) {
    %c0_i32 = arith.constant 0 : i32
    %c0_i32_0 = arith.constant 0 : i32
    %c0_i32_1 = arith.constant 0 : i32
    return %arg0, %c0_i32, %c0_i32_0 : i32, i32, i32
  }
  func.func @transform_1(%arg0: i32) -> (i32, i32, i32) {
    %c0_i32 = arith.constant 0 : i32
    %c0_i32_0 = arith.constant 0 : i32
    %c0_i32_1 = arith.constant 0 : i32
    return %arg0, %c0_i32, %c0_i32_0 : i32, i32, i32
  }
  func.func @transform_2(%arg0: i32) -> (i32, i32) {
    %c0_i32 = arith.constant 0 : i32
    %c0_i32_0 = arith.constant 0 : i32
    %c0_i32_1 = arith.constant 0 : i32
    return %c0_i32, %c0_i32_0 : i32, i32
  }
  func.func @transform_3(%arg0: i32) -> (i32, i32) {
    %c0_i32 = arith.constant 0 : i32
    %c0_i32_0 = arith.constant 0 : i32
    %c0_i32_1 = arith.constant 0 : i32
    return %c0_i32, %c0_i32_0 : i32, i32
  }
  func.func @transform_4(%arg0: i32) -> (i32, i32) {
    %c0_i32 = arith.constant 0 : i32
    %c0_i32_0 = arith.constant 0 : i32
    %c0_i32_1 = arith.constant 0 : i32
    return %c0_i32, %c0_i32_0 : i32, i32
  }
  func.func @transform_5(%arg0: i32) -> (i32, i32) {
    %c0_i32 = arith.constant 0 : i32
    %c0_i32_0 = arith.constant 0 : i32
    %c0_i32_1 = arith.constant 0 : i32
    return %c0_i32, %c0_i32_0 : i32, i32
  }
  func.func @transform_6(%arg0: i32) -> (i32, i32) {
    %c0_i32 = arith.constant 0 : i32
    %c0_i32_0 = arith.constant 0 : i32
    %c0_i32_1 = arith.constant 0 : i32
    return %c0_i32, %c0_i32_0 : i32, i32
  }
  func.func @transform_7(%arg0: i32) -> (i32, i32) {
    %c0_i32 = arith.constant 0 : i32
    %c0_i32_0 = arith.constant 0 : i32
    %c0_i32_1 = arith.constant 0 : i32
    return %c0_i32, %c0_i32_0 : i32, i32
  }
  func.func @transform_8(%arg0: i32) -> (i32, i32) {
    %c0_i32 = arith.constant 0 : i32
    %c0_i32_0 = arith.constant 0 : i32
    %c0_i32_1 = arith.constant 0 : i32
    return %c0_i32, %c0_i32_0 : i32, i32
  }
  func.func @transform_9(%arg0: i32) -> (i32, i32) {
    %c0_i32 = arith.constant 0 : i32
    %c0_i32_0 = arith.constant 0 : i32
    %c0_i32_1 = arith.constant 0 : i32
    return %c0_i32, %c0_i32_0 : i32, i32
  }
  func.func @transform_10(%arg0: i32) -> (i32, i32) {
    %c0_i32 = arith.constant 0 : i32
    %c0_i32_0 = arith.constant 0 : i32
    %c0_i32_1 = arith.constant 0 : i32
    return %c0_i32, %c0_i32_0 : i32, i32
  }
  func.func @transform_11(%arg0: i32) -> (i32, i32) {
    %c0_i32 = arith.constant 0 : i32
    %c0_i32_0 = arith.constant 0 : i32
    %c0_i32_1 = arith.constant 0 : i32
    return %c0_i32, %c0_i32_0 : i32, i32
  }
  func.func @transform_12(%arg0: i32) -> (i32, i32) {
    %c0_i32 = arith.constant 0 : i32
    %c0_i32_0 = arith.constant 0 : i32
    %c0_i32_1 = arith.constant 0 : i32
    return %c0_i32, %c0_i32_0 : i32, i32
  }
  func.func @transform_13(%arg0: i32) -> (i32, i32) {
    %c0_i32 = arith.constant 0 : i32
    %c0_i32_0 = arith.constant 0 : i32
    %c0_i32_1 = arith.constant 0 : i32
    return %c0_i32, %c0_i32_0 : i32, i32
  }
  func.func @transform_14(%arg0: i32) -> (i32, i32, i32) {
    %c0_i32 = arith.constant 0 : i32
    %c0_i32_0 = arith.constant 0 : i32
    %c0_i32_1 = arith.constant 0 : i32
    return %arg0, %c0_i32, %c0_i32_0 : i32, i32, i32
  }
}

</mosaic_0001>

<bundles_post_ra>
// kernel: residual_attention_block.1
= control target key start
LH: loop header
LB: loop body
LE: loop exit
PB: predicated region body
PF: predicated region fallthrough
CT: control target
= control target key end

     0   :  { %s3536_s0 = inlined_call_operand.hbm [shape: f32[2,8,128], index: 0, kind: input, shape index: {}, may-alias: {0,14}]   ;;  %s3537_s1 = inlined_call_operand.vmem [shape: f32[2,1,8], index: 1, kind: input, shape index: {}]   ;;  %s3538_s2 = inlined_call_operand.vmem [shape: f32[1,128], index: 2, kind: input, shape index: {}]   ;;  %s3539_s3 = inlined_call_operand.vmem [shape: f32[1,128], index: 3, kind: input, shape index: {}]   ;;  %s3540_s4 = inlined_call_operand.hbm [shape: bf16[128,384], index: 4, kind: input, shape index: {}]   ;;  %s3541_s5 = inlined_call_operand.vmem [shape: f32[1,384], index: 5, kind: input, shape index: {}]   ;;  %s3542_s6 = inlined_call_operand.vmem [shape: bf16[128,128], index: 6, kind: input, shape index: {}]   ;;  %s3543_s7 = inlined_call_operand.vmem [shape: f32[1,128], index: 7, kind: input, shape index: {}]   ;;  %s3544_s8 = inlined_call_operand.vmem [shape: f32[1,128], index: 8, kind: input, shape index: {}]   ;;  %s3545_s9 = inlined_call_operand.vmem [shape: f32[1,128], index: 9, kind: input, shape index: {}]   ;;  %s3546_s10 = inlined_call_operand.hbm [shape: bf16[128,512], index: 10, kind: input, shape index: {}]   ;;  %s3547_s11 = inlined_call_operand.vmem [shape: f32[1,512], index: 11, kind: input, shape index: {}]   ;;  %s3548_s12 = inlined_call_operand.hbm [shape: bf16[512,128], index: 12, kind: input, shape index: {}]   ;;  %s3549_s13 = inlined_call_operand.vmem [shape: f32[1,128], index: 13, kind: input, shape index: {}]   ;;  %s3550_s14 = inlined_call_operand.hbm [shape: f32[2,8,128], index: 14, kind: output, shape index: {}, may-alias: {0,14}]  }
   0x1   :  { %3557 = sst [smem:[#allocation17_spill]] %s3540_s4 }
   0x2   :  { %3558 = sst [smem:[#allocation18_spill]] %s3544_s8 }
   0x3   :  { %3559 = sst [smem:[#allocation19_spill]] %s3545_s9 }
   0x4   :  { %3560 = sst [smem:[#allocation20_spill]] %s3547_s11 }
   0x5   :  { %3561 = sst [smem:[#allocation21_spill]] %s3549_s13 }
   0x6   :  { %3562 = sst [smem:[#allocation22_spill]] %s3550_s14 }
   0x7   :  { %19 = vsyncpa [#allocation3], 0 }
   0x8   :  { %21 = vsyncpa [#allocation3 + $0x1], 0 }
   0x9   :  { %22 = vsyncpa [#allocation6], 0 }
   0xa   :  { %23 = vsyncpa [#allocation9], 0 }
   0xb   :  { %24 = vsyncpa [#allocation4], 0 }
   0xc   :  { %26 = vsyncpa [#allocation4 + $0x1], 0  ;;  %s3099_s29 = smov 0   ;;  %s3101_s30 = smov 0  }
   0xd   :  { %s3103_s15 = smov 0   ;;  %s3105_s16 = smov 0  }
   0xe LB: > { %3563 = sst [smem:[#allocation15_spill]] %s2993_s29  ;;  %s3120_s17 = sadd.s32 4294967295, %s3005_s16   ;;  %s3005_s16 = sphi %s3105_s16, %s3592_s16   ;;  %s3001_s15 = sphi %s3103_s15, %s3591_s15   ;;  %s2997_s30 = sphi %s3101_s30, %s3590_s30   ;;  %s2993_s29 = sphi %s3099_s29, %s3589_s29  }
   0xf   : > { %s2269_s18 = sadd.s32 4294967294, %s3005_s16   ;;  %p52_p0 = scmp.ne.s32.totalorder %s2997_s30, %s2993_s29 }
  0x10   : > { %p3554_p1 = scmp.eq.s32.totalorder %s3120_s17, 0  ;;  %p360_p3 = scmp.eq.s32.totalorder %s2269_s18, 1 }
  0x11   : > { %p2270_p5 = scmp.ge.s32.totalorder %s3005_s16, 1  ;;  %p367_p7 = scmp.lt.s32.totalorder %s3005_s16, 3 }
  0x12   : > { %p3129_p4 = por %p3554_p1, %p52_p0  ;;  %p3134_p6 = por %p360_p3, %p52_p0 }
  0x13   : > { %p3139_p8 = pnand %p2270_p5, %p367_p7  ;;  %s3007_s22 = smov [#allocation5]  }
  0x14   : > { %s3564_s19 = scalar_select %p3129_p4, 1, 0 }
  0x15   : > { %s3565_s20 = scalar_select %p3134_p6, 1, 0 }
  0x16   : > { %s3567_s21 = scalar_select %p3139_p8, 1, 0 }
  0x17   : > { %3566 = sst [smem:[#allocation16_spill]] %s3565_s20  ;;  %s385_s23 = sshll.u32 %s3007_s22, 4  ;;  %s3143_s23 = int_to_ptr.vmem [resolvable:$true] %s385_s23 }
  0x18   : > { %p2584_p9 = pneg %p3139_p8  ;;  %s3008_s25 = smov [#allocation7]  }
  0x19   : > { %s413_s26 = sshll.u32 %s3008_s25, 4  ;;  %s3569_s4 = sld [smem:[#allocation17_spill]]  ;;  %s3154_s26 = int_to_ptr.vmem [resolvable:$true] %s413_s26 }
  0x1a   : > { %p3150_p11 = pnand %p2584_p9, %p3554_p1 }
  0x1c   : > { %p3164_p13 = pneg %p3150_p11 }
  0x1f   : > { %s2817_s18 = scalar_lea.hbm %s3569_s4, 3072 }
  0x20   : > { %p2818_p12 = scmp.ne.s32.totalorder %s3569_s4, %s2817_s18  ;;  %p2824_p5 = scmp.lt.u32.totalorder %s2817_s18, %s3569_s4 }
  0x22   : > { %p2820_p0 = pnand %p3164_p13, %p2818_p12 }
  0x24   : > { %p2821_p3 = pneg %p2820_p0 }
  0x26   : > { %p2826_p7 = pnand %p2824_p5, %p2821_p3 }
  0x28   : > { %2829 = shalt.err (!%p2826_p7)
}
  0x29   : > { %s2830_s20 = scalar_lea.vmem %s3143_s23, 3072  ;;  %p2838_p2 = scmp.lt.s32.totalorder %s3143_s23, %s3143_s23 }
  0x2a   : > { %p2831_p9 = scmp.ne.s32.totalorder %s3143_s23, %s2830_s20  ;;  %p2839_p6 = scmp.lt.s32.totalorder %s2830_s20, %s2830_s20 }
  0x2c   : > { %p2833_p10 = pnand %p2831_p9, %p3164_p13  ;;  %p2840_p12 = por %p2839_p6, %p2838_p2 }
  0x2e   : > { %p2834_p1 = pneg %p2833_p10 }
  0x30   : > { %p2841_p0 = pnand %p2840_p12, %p2834_p1 }
  0x32   : > { %2844 = shalt.err (!%p2841_p0)
}
  0x33   : > { %s3009_s27 = smov 192   ;;  %s3010_s14 = smov 12  }
  0x34   : > { %2587 = dma.hbm_to_vmem [thread:$0]  (!%p3150_p11), %s3569_s4, 3072, %s3143_s23, [#allocation6], %s3009_s27, %s3009_s27, %s3010_s14  }
  0x35   : > { %s2845_s13 = scalar_lea.hbm %s3546_s10, 4096 }
  0x36   : > { %p2846_p2 = scmp.ne.s32.totalorder %s3546_s10, %s2845_s13  ;;  %p2852_p10 = scmp.lt.u32.totalorder %s2845_s13, %s3546_s10 }
  0x38   : > { %p2848_p1 = pnand %p2846_p2, %p3164_p13 }
  0x3a   : > { %p2849_p6 = pneg %p2848_p1 }
  0x3c   : > { %p2854_p3 = pnand %p2852_p10, %p2849_p6 }
  0x3e   : > { %2857 = shalt.err (!%p2854_p3)
}
  0x3f   : > { %s2858_s23 = scalar_lea.vmem %s3154_s26, 4096  ;;  %p2866_p12 = scmp.lt.s32.totalorder %s3154_s26, %s3154_s26 }
  0x40   : > { %p2859_p5 = scmp.ne.s32.totalorder %s3154_s26, %s2858_s23  ;;  %p2867_p0 = scmp.lt.s32.totalorder %s2858_s23, %s2858_s23 }
  0x42   : > { %p2861_p7 = pnand %p2859_p5, %p3164_p13  ;;  %p2868_p2 = por %p2867_p0, %p2866_p12 }
  0x44   : > { %p2862_p9 = pneg %p2861_p7 }
  0x46   : > { %p2869_p1 = pnand %p2868_p2, %p2862_p9 }
  0x48   : > { %2872 = shalt.err (!%p2869_p1)
}
  0x49   : > { %s3011_s9 = smov 256   ;;  %s3012_s8 = smov 16  }
  0x4a   : > { %2590 = dma.hbm_to_vmem [thread:$0]  (!%p3150_p11), %s3546_s10, 4096, %s3154_s26, [#allocation6], %s3011_s9, %s3011_s9, %s3012_s8  }
  0x4b   : > { %s3013_s27 = smov [#allocation8]   ;;  %s2873_s22 = scalar_lea.hbm %s3548_s12, 4096 }
  0x4c   : > { %s429_s14 = sshll.u32 %s3013_s27, 4  ;;  %p2874_p6 = scmp.ne.s32.totalorder %s3548_s12, %s2873_s22  ;;  %s430_s14 = int_to_ptr.vmem [resolvable:$true] %s429_s14 }
  0x4d   : > { %p2880_p5 = scmp.lt.u32.totalorder %s2873_s22, %s3548_s12 }
  0x4e   : > { %p2876_p10 = pnand %p2874_p6, %p3164_p13 }
  0x50   : > { %p2877_p3 = pneg %p2876_p10 }
  0x52   : > { %p2882_p7 = pnand %p2880_p5, %p2877_p3 }
  0x54   : > { %2885 = shalt.err (!%p2882_p7)
}
  0x55   : > { %s2886_s26 = scalar_lea.vmem %s430_s14, 4096  ;;  %p2894_p2 = scmp.lt.s32.totalorder %s430_s14, %s430_s14 }
  0x56   : > { %p2887_p9 = scmp.ne.s32.totalorder %s430_s14, %s2886_s26  ;;  %p2895_p1 = scmp.lt.s32.totalorder %s2886_s26, %s2886_s26 }
  0x58   : > { %p2889_p12 = pnand %p2887_p9, %p3164_p13  ;;  %p2896_p4 = por %p2895_p1, %p2894_p2 }
  0x5a   : > { %p2890_p0 = pneg %p2889_p12 }
  0x5c   : > { %p2897_p8 = pnand %p2896_p4, %p2890_p0 }
  0x5e   : > { %2900 = shalt.err (!%p2897_p8)
}
  0x5f   : > { %s3014_s9 = smov 64   ;;  %s3015_s4 = smov 4  }
  0x60   : > { %2593 = dma.hbm_to_vmem [thread:$0]  (!%p3150_p11), %s3548_s12, 4096, %s430_s14, [#allocation9], %s3014_s9, %s3014_s9, %s3015_s4  }
  0x61   : > { %s3227_s11 = sadd.s32 1, %s3005_s16   ;;  %s39_s27 = sadd.s32 1, %s3001_s15 }
  0x62   : > { %s36_s13 = ssub.s32 %s3005_s16, %s3227_s11  ;;  %p46_p8 = scmp.ne.s32.totalorder %s3001_s15, %s2997_s30 }
  0x63   : > { %p37_p4 = scmp.eq.s32.totalorder %s36_s13, 0  ;;  %p47_p13 = scmp.eq.s32.totalorder %s3005_s16, 0 }
  0x64   : > { %p2605_p6 = scmp.lt.s32.totalorder %s3005_s16, 2  ;;  %p3571_p3 = scmp.eq.s32.totalorder %s3120_s17, 1 }
  0x65   : > { %s3237_s28 = scalar_select %p37_p4, %s3001_s15, %s39_s27  }
  0x66   : > { %p48_p10 = por %p47_p13, %p46_p8  ;;  %p3241_p5 = por %p3571_p3, %p46_p8 }
  0x67   : > { %s446_s24 = sand.u32 1, %s3001_s15   ;;  %s2276_s22 = sshll.u32 %s3005_s16, 7 }
  0x68   : > { %s2275_s14 = sshll.u32 %s446_s24, 3  ;;  %s3250_s23 = scalar_lea.hbm %s3536_s0, %s2276_s22 }
  0x69   : > { %s450_s26 = scalar_lea.vmem [#allocation2], %s2275_s14  ;;  %p3252_p11 = pnand %p2605_p6, %p48_p10 }
  0x6a   : > { %s457_s9 = sshll.u32 %s450_s26, 4  ;;  %s447_s29 = scalar_lea.sflag [#allocation3], %s446_s24  ;;  %s3256_s9 = int_to_ptr.vmem [resolvable:$true] %s457_s9 }
  0x6b   : > { %s2901_s8 = scalar_lea.hbm %s3250_s23, 128  ;;  %p2903_p9 = pneg %p3252_p11 }
  0x6c   : > { %p2902_p7 = scmp.ne.s32.totalorder %s3250_s23, %s2901_s8  ;;  %s2906_s22 = scalar_lea.hbm %s3536_s0, 256 }
  0x6d   : > { %p2907_p2 = scmp.lt.u32.totalorder %s3250_s23, %s3536_s0  ;;  %p2908_p1 = scmp.lt.u32.totalorder %s2906_s22, %s2901_s8 }
  0x6e   : > { %p2904_p12 = pnand %p2903_p9, %p2902_p7  ;;  %p2910_p8 = scmp.lt.u32.totalorder %s2901_s8, %s3250_s23 }
  0x6f   : > { %p2909_p4 = por %p2908_p1, %p2907_p2 }
  0x70   : > { %p2905_p0 = pneg %p2904_p12 }
  0x71   : > { %p2911_p13 = por %p2910_p8, %p2909_p4 }
  0x73   : > { %p2912_p6 = pnand %p2911_p13, %p2905_p0 }
  0x75   : > { %2915 = shalt.err (!%p2912_p6)
}
  0x76   : > { %s2916_s24 = scalar_lea.vmem %s3256_s9, 128  ;;  %s3016_s20 = smov [#allocation2]  }
  0x77   : > { %p2917_p10 = scmp.ne.s32.totalorder %s3256_s9, %s2916_s24  ;;  %s2921_s26 = sshll.u32 %s3016_s20, 4  ;;  %s2922_s26 = int_to_ptr.vmem [resolvable:$false] %s2921_s26 }
  0x78   : > { %s2923_s13 = scalar_lea.vmem %s2922_s26, 256  ;;  %p2924_p12 = scmp.lt.s32.totalorder %s3256_s9, %s2922_s26 }
  0x79   : > { %p2919_p3 = pnand %p2917_p10, %p2903_p9  ;;  %p2925_p2 = scmp.lt.s32.totalorder %s2923_s13, %s2916_s24 }
  0x7b   : > { %p2920_p7 = pneg %p2919_p3  ;;  %p2926_p1 = por %p2925_p2, %p2924_p12 }
  0x7d   : > { %p2927_p4 = pnand %p2926_p1, %p2920_p7 }
  0x7f   : > { %2930 = shalt.err (!%p2927_p4)
}
  0x80   : > { %2597 = dma.hbm_to_vmem [thread:$0]  (!%p3252_p11), %s3250_s23, 128, %s3256_s9, %s447_s29  }
  0x81   : > { %p3574_p0 = scmp.ne.s32.totalorder %s3567_s21, 0 }
  0x82   : > { %s3286_s8 = sand.u32 (!%p3574_p0), 1, %s2997_s30   ;;  %p3575_p9 = scmp.ne.s32.totalorder (!%p3574_p0), %s3564_s19, 0 }
  0x83   : > { %472 = sbr.rel (%p3574_p0) target bundleno = 2756 (0xac4), region = 76  ;;  %s2278_s27 = sshll.u32 (!%p3574_p0), %s3286_s8, 3 }
  0x84   : > { %s475_s22 = scalar_lea.sflag (!%p3574_p0), [#allocation3], %s3286_s8  ;;  %s478_s14 = scalar_lea.vmem (!%p3574_p0), [#allocation2], %s2278_s27 }
  0x8a   : > { %2976 = dma.done.wait (%p3575_p9), %s475_s22, 128  }
  0x8b   : > { %2978 = vsyncadd (%p3575_p9), %s475_s22, 4294967168  ;;  %p3576_p11 = scmp.eq.s32.totalorder %s3120_s17, 0 }
  0x8d   : > { %2980 = dma.done.wait (%p3576_p11), [#allocation6], 7168   ;;  %p3577_p8 = pmov %p3576_p11 }
  0x8f   : > { %2982 = vsyncadd (%p3577_p8), [#allocation6], 4294960128  ;;  %p3578_p13 = pmov %p3577_p8 }
  0x90   : > { %p3579_p6 = pmov %p3577_p8 }
  0x91   : > { %2984 = dma.done.wait (%p3578_p13), [#allocation9], 4096  }
  0x92   : > { %2986 = vsyncadd (%p3579_p6), [#allocation9], 4294963200  ;;  %v3304_v0 = vld [vmem:[%s478_s14] sm:$0xff]  ;;  %v2659_v6 = vld [vmem:[#allocation5] ss:$12 sps:$4 sm:$0xff]   ;;  %v3017_v8 = vmov 0.0   ;;  %v613_v46 = vlaneseq }
  0x93   : > { %545 = vadd.xlane.f32.xlu0 %v3304_v0  ;;  %v2657_v5 = vld [vmem:[#allocation5 + $0x4] ss:$12 sps:$4 sm:$0xff]   ;;  %v2660_v7 = vld [vmem:[#allocation5 + $0x8] ss:$12 sps:$4 sm:$0xff]   ;;  %2480 = vmatprep.subr.bf16.mxu1 %v3017_v8  ;;  %v2664_v11 = vld [vmem:[#allocation5 + $0x20] ss:$12 sps:$4 sm:$0xff]  }
  0x94   : > { %756 = vmatprep.subr.bf16.mxu0 %v2657_v5  ;;  %2481 = vmatpush3.bf16.msra.mxu1 %v2660_v7  ;;  %v2661_v9 = vld [vmem:[#allocation5 + $0x1c] ss:$12 sps:$4 sm:$0xff]   ;;  %v2663_v10 = vld [vmem:[#allocation5 + $0x18] ss:$12 sps:$4 sm:$0xff]   ;;  %v2665_v12 = vld [vmem:[#allocation5 + $0x34] ss:$12 sps:$4 sm:$0xff]  }
  0x95   : > { %757 = vmatpush1.bf16.msra.mxu0 %v2659_v6  ;;  %2482 = vmatprep.subr.bf16.mxu1 %v3017_v8  ;;  %v2667_v13 = vld [vmem:[#allocation5 + $0x30] ss:$12 sps:$4 sm:$0xff]   ;;  %v2668_v14 = vld [vmem:[#allocation5 + $0x38] ss:$12 sps:$4 sm:$0xff]   ;;  %v2671_v16 = vld [vmem:[#allocation5 + $0x48] ss:$12 sps:$4 sm:$0xff]  }
  0x96   : > { %758 = vmatprep.subr.bf16.mxu0 %v2661_v9  ;;  %v2669_v15 = vld [vmem:[#allocation5 + $0x4c] ss:$12 sps:$4 sm:$0xff]   ;;  %v2672_v17 = vld [vmem:[#allocation5 + $0x50] ss:$12 sps:$4 sm:$0xff]   ;;  %v2676_v20 = vld [vmem:[#allocation5 + $0x68] ss:$12 sps:$4 sm:$0xff]  }
  0x97   : > { %v2673_v18 = vld [vmem:[#allocation5 + $0x64] ss:$12 sps:$4 sm:$0xff]   ;;  %v2675_v19 = vld [vmem:[#allocation5 + $0x60] ss:$12 sps:$4 sm:$0xff]   ;;  %v2677_v21 = vld [vmem:[#allocation5 + $0x7c] ss:$12 sps:$4 sm:$0xff]  }
  0x98   : > { %2483 = vmatpush3.bf16.msra.mxu1 %v2664_v11  ;;  %v3018_v22 = vmov 0   ;;  %vm3019_vm0 = vmmov 0   ;;  %v2679_v23 = vld [vmem:[#allocation5 + $0x78] ss:$12 sps:$4 sm:$0xff]   ;;  %v2680_v24 = vld [vmem:[#allocation5 + $0x80] ss:$12 sps:$4 sm:$0xff]  }
  0x99   : > { %759 = vmatpush1.bf16.msra.mxu0 %v2663_v10  ;;  %2484 = vmatprep.subr.bf16.mxu1 %v3017_v8  ;;  %v2681_v25 = vld [vmem:[#allocation5 + $0x94] ss:$12 sps:$4 sm:$0xff]   ;;  %v2683_v26 = vld [vmem:[#allocation5 + $0x90] ss:$12 sps:$4 sm:$0xff]   ;;  %v2684_v27 = vld [vmem:[#allocation5 + $0x98] ss:$12 sps:$4 sm:$0xff]  }
  0x9a   : > { %760 = vmatprep.subr.bf16.mxu0 %v2665_v12  ;;  %788 = vmatprep.mubr.bf16.mxu0 %v3018_v22  ;;  %v2685_v28 = vld [vmem:[#allocation5 + $0xac] ss:$12 sps:$4 sm:$0xff]   ;;  %v2687_v29 = vld [vmem:[#allocation5 + $0xa8] ss:$12 sps:$4 sm:$0xff]   ;;  %v2688_v30 = vld [vmem:[#allocation5 + $0xb0] ss:$12 sps:$4 sm:$0xff]  }
  0x9b   : > { %2496 = vmatprep.mubr.msk.bf16.mxu1 %vm3019_vm0, %v3017_v8  ;;  %v2283_v40 = vld [vmem:[%s3538_s2] ss:$0 sm:$0xff]  ;;  %v3336_v47 = vshrl.u32 %v613_v46, 7  ;;  %vm1123_vm3 = vcmask 1043456   ;;  %vm886_vm4 = vcmask 261120   ;;  %s3020_s25 = smov 64  }
  0x9c   : > { %2485 = vmatpush3.bf16.msra.mxu1 %v2668_v14  ;;  %v2284_v42 = vld [vmem:[%s3539_s3] ss:$0 sm:$0xff]  ;;  %s3021_s24 = smov 96   ;;  %s3022_s20 = smov 32   ;;  %vm1071_vm5 = vcmask 64512   ;;  %vm1318_vm6 = vcmask 523264  }
  0x9d   : > { %761 = vmatpush1.bf16.msra.mxu0 %v2667_v13  ;;  %2486 = vmatprep.subr.bf16.mxu1 %v3017_v8  ;;  %v623_v48 = vsub.s32 2, %v3336_v47  ;;  %v611_v49 = vld [vmem:[%s3541_s5] sm:$0x7]  ;;  %v619_v50 = vsub.s32 1, %v3336_v47  ;;  %v615_v52 = vsub.s32 0, %v3336_v47  ;;  %p538_p10 = scmp.lt.s32.totalorder %s3120_s17, 1 }
  0x9e   : > { %762 = vmatprep.subr.bf16.mxu0 %v2669_v15  ;;  %vm1320_vm7 = vcmask 785408   ;;  %s3580_s13 = sld [smem:[#allocation18_spill]]  ;;  %s3583_s4 = sld [smem:[#allocation21_spill]] }
  0x9f   : > { %v624_v51 = vrot.slane %v611_v49, %v623_v48  ;;  %v620_v53 = vrot.slane %v611_v49, %v619_v50  ;;  %v616_v59 = vrot.slane %v611_v49, %v615_v52  ;;  %s539_s26 = scalar_select %p538_p10, %s3120_s17, 1 }
  0xa0   : > { %2487 = vmatpush3.bf16.msra.mxu1 %v2672_v17  ;;  %s2399_s29 = sshll.u32 %s3120_s17, 7  ;;  %s2148_s19 = scalar_lea.sflag [#allocation4], %s3286_s8 }
  0xa1   : > { %763 = vmatpush1.bf16.msra.mxu0 %v2671_v16  ;;  %2488 = vmatprep.subr.bf16.mxu1 %v3017_v8  ;;  %s540_s14 = scalar_lea.vmem %s3537_s1, %s539_s26  ;;  %s3023_s17 = smov [#allocation10]  }
  0xa2   : > { %764 = vmatprep.subr.bf16.mxu0 %v2673_v18 }
  0xa4   : > { %2489 = vmatpush3.bf16.msra.mxu1 %v2676_v20 }
  0xa5   : > { %765 = vmatpush1.bf16.msra.mxu0 %v2675_v19  ;;  %2490 = vmatprep.subr.bf16.mxu1 %v3017_v8 }
  0xa6   : > { %766 = vmatprep.subr.bf16.mxu0 %v2677_v21 }
  0xa8   : > { %2491 = vmatpush3.bf16.msra.mxu1 %v2680_v24 }
  0xa9   : > { %767 = vmatpush1.bf16.msra.mxu0 %v2679_v23  ;;  %2492 = vmatprep.subr.bf16.mxu1 %v3017_v8 }
  0xaa   : > { %768 = vmatprep.subr.bf16.mxu0 %v2681_v25  ;;  %v2309_v25 = vld [vmem:[%s540_s14] ss:$0 sm:$0xff]  ;;  %s3584_s14 = sld [smem:[#allocation22_spill]] }
  0xac   : > { %2493 = vmatpush3.bf16.msra.mxu1 %v2684_v27 }
  0xad   : > { %769 = vmatpush1.bf16.msra.mxu0 %v2683_v26  ;;  %2494 = vmatprep.subr.bf16.mxu1 %v3017_v8 }
  0xae   : > { %770 = vmatprep.subr.bf16.mxu0 %v2685_v28 }
  0xb0   : > { %2495 = vmatpush3.bf16.msra.mxu1 %v2688_v30 }
  0xb1   : > { %771 = vmatpush1.bf16.msra.mxu0 %v2687_v29  ;;  %2500 = vmatprep.subr.bf16.mxu1 %v3017_v8 }
  0xb2   : > { %2524 = vmatprep.subr.bf16.mxu0 %v3017_v8 }
 0x120   : > { %v546_v1 = vpop.xlane.xlu0 %545 }
 0x121   : > { %v548_v2 = vmul.f32 0.0078125, %v546_v1 }
 0x123   : > { %v3308_v3 = vsub.f32 %v3304_v0, %v548_v2 }
 0x125   : > { %v550_v4 = vmul.f32 %v3308_v3, %v3308_v3 }
 0x127   : > { %551 = vadd.xlane.f32.xlu0 %v550_v4 }
 0x1b4   : > { %v552_v31 = vpop.xlane.xlu0 %551 }
 0x1b5   : > { %v553_v32 = vmul.f32 0.0078125, %v552_v31 }
 0x1b7   : > { %v554_v33 = vadd.f32 1e-12, %v553_v32 }
 0x1b9   : > { %2777 = vrsqrt.f32 %v554_v33  ;;  %vm557_vm1 = vcmp.eq.f32.partialorder %v554_v33, inf  ;;  %v560_v36 = vand.u32 2147483648, %v554_v33  ;;  %vm559_vm2 = vcmp.eq.f32.partialorder %v554_v33, 0.0 }
 0x1c3   : > { %v2778_v34 = vpop.eup %2777 }
 0x1c4   : > { %v556_v35 = vmul.f32 %v2778_v34, %v554_v33 }
 0x1c6   : > { %v558_v37 = vsel %vm557_vm1, %v554_v33, %v556_v35 }
 0x1c7   : > { %v561_v38 = vsel %vm559_vm2, %v560_v36, %v558_v37 }
 0x1c8   : > { %2779 = vrcp.f32 %v561_v38 }
 0x1d2   : > { %v2780_v39 = vpop.eup %2779 }
 0x1d3   : > { %v563_v41 = vmul.f32 %v2780_v39, %v3308_v3 }
 0x1d5   : > { %v570_v43 = vmul.f32 %v2283_v40, %v563_v41 }
 0x1d7   : > { %v577_v44 = vadd.f32 %v2284_v42, %v570_v43 }
 0x1d9   : > { %v578_v45 = vpack.c.bf16 %v577_v44, %v577_v44 }
 0x1db   : > { %789 = vmatmul.mubr.bf16.vlgmr.msra.gmra.mrb[0].mxu0 %v578_v45  ;;  %2497 = vmatmul.mubr.bf16.vlgmr.msra.gmra.mrb[0].mxu1 %v578_v45 }
 0x1dc   : > { %2502 = vmatprep.mubr.msk.bf16.mxu1 %vm3019_vm0, %v3017_v8  ;;  %2526 = vmatprep.mubr.msk.bf16.mxu0 %vm3019_vm0, %v3017_v8 }
 0x2ae   : > { %v790_v54 = vpop.f32.mrb[0].mxu0  ;;  %v831_v55 = vpop.f32.mrb[0].mxu1 }
 0x2af   : > { %v3348_v56 = vadd.f32 %v831_v55, %v624_v51  ;;  %v792_v57 = vpop.f32.mrb[1].mxu0  ;;  %v2498_v58 = vpop.f32.mrb[1].mxu1  ;;  %v791_v5 = vadd.f32 %v790_v54, %v616_v59 }
 0x2b0   : > { %v793_v60 = vadd.f32 %v792_v57, %v620_v53  ;;  %v794_v61 = vpop.f32.mrb[2].mxu0  ;;  %v834_v62 = vpop.f32.mrb[2].mxu1 }
 0x2b1   : > { %v795_v63 = vpop.f32.mrb[3].mxu0  ;;  %v2499_v1 = vpop.f32.mrb[3].mxu1  ;;  %v875_v2 = vpack.c.bf16 %v3348_v56, %v3348_v56  ;;  %v847_v7 = vpack.c.bf16 %v791_v5, %v791_v5 }
 0x2b2   : > { %855 = vrot.lane.b32.xlu0 %v793_v60, %s3020_s25  ;;  %852 = vrot.lane.b32.xlu1 %v793_v60, %s3021_s24  ;;  %v861_v3 = vpack.c.bf16 %v793_v60, %v793_v60 }
 0x2b3   : > { %v1125_v4 = vsel %vm1123_vm3, %v875_v2, 0 }
 0x2b4   : > { %2525 = vmatpush3.bf16.msra.mxu0 %v1125_v4  ;;  %v891_v6 = vsel %vm886_vm4, %v861_v3, 0 }
 0x2b5   : > { %2501 = vmatpush3.bf16.xpose.msra.mxu1 %v891_v6  ;;  %2536 = vmatprep.subr.bf16.mxu0 %v3017_v8 }
 0x2b6   : > { %838 = vrot.lane.b32.xlu1 %v791_v5, %s3021_s24  ;;  %2506 = vmatprep.subr.bf16.mxu1 %v3017_v8 }
 0x2ba   : > { %841 = vrot.lane.b32.xlu1 %v791_v5, %s3020_s25 }
 0x2bc   : > { %2503 = vmatmul.mubr.msk.bf16.vlgmr.msra.gmra.mrb[4].mxu1 %vm886_vm4, %v847_v7 }
 0x2bd   : > { %2508 = vmatprep.mubr.msk.bf16.mxu1 %vm3019_vm0, %v3017_v8 }
 0x2be   : > { %858 = vrot.lane.b32.xlu1 %v793_v60, %s3022_s20 }
 0x2c2   : > { %844 = vrot.lane.b32.xlu1 %v791_v5, %s3022_s20 }
 0x324   : > { %v853_v9 = vpop.permute.xlu1 %852  ;;  %v856_v12 = vpop.permute.xlu0 %855 }
 0x325   : > { %v862_v10 = vpack.c.bf16 %v853_v9, %v853_v9  ;;  %v863_v14 = vpack.c.bf16 %v856_v12, %v856_v12 }
 0x327   : > { %v937_v11 = vsel %vm886_vm4, %v862_v10, 0  ;;  %v983_v17 = vsel %vm886_vm4, %v863_v14, 0 }
 0x328   : > { %v839_v13 = vpop.permute.xlu1 %838  ;;  %2507 = vmatpush3.bf16.xpose.msra.mxu1 %v937_v11 }
 0x329   : > { %2512 = vmatprep.subr.bf16.mxu1 %v3017_v8  ;;  %v848_v16 = vpack.c.bf16 %v839_v13, %v839_v13 }
 0x32c   : > { %v842_v15 = vpop.permute.xlu1 %841 }
 0x32d   : > { %v849_v20 = vpack.c.bf16 %v842_v15, %v842_v15 }
 0x32f   : > { %2509 = vmatmul.mubr.msk.bf16.vlgmr.msra.gmra.mrb[8].mxu1 %vm886_vm4, %v848_v16 }
 0x330   : > { %v859_v18 = vpop.permute.xlu1 %858  ;;  %2513 = vmatpush3.bf16.xpose.msra.mxu1 %v983_v17  ;;  %2514 = vmatprep.mubr.msk.bf16.mxu1 %vm3019_vm0, %v3017_v8 }
 0x331   : > { %2518 = vmatprep.subr.bf16.mxu1 %v3017_v8  ;;  %v864_v19 = vpack.c.bf16 %v859_v18, %v859_v18 }
 0x333   : > { %v1029_v21 = vsel %vm886_vm4, %v864_v19, 0 }
 0x334   : > { %v845_v23 = vpop.permute.xlu1 %844 }
 0x335   : > { %v850_v24 = vpack.c.bf16 %v845_v23, %v845_v23 }
 0x337   : > { %2515 = vmatmul.mubr.msk.bf16.vlgmr.msra.gmra.mrb[12].mxu1 %vm886_vm4, %v849_v20 }
 0x338   : > { %2519 = vmatpush3.bf16.xpose.msra.mxu1 %v1029_v21  ;;  %2520 = vmatprep.mubr.msk.bf16.mxu1 %vm3019_vm0, %v3017_v8 }
 0x339   : > { %2530 = vmatprep.subr.bf16.mxu1 %v3017_v8 }
 0x33f   : > { %2521 = vmatmul.mubr.msk.bf16.vlgmr.msra.gmra.mrb[16].mxu1 %vm886_vm4, %v850_v24 }
 0x340   : > { %2532 = vmatprep.mubr.msk.bf16.mxu1 %vm3019_vm0, %v3017_v8 }
 0x38f   : > { %v927_v26 = vpop.f32.mrb[4].mxu1 }
 0x390   : > { %v928_v27 = vadd.f32 %v2309_v25, %v927_v26  ;;  %v2504_v28 = vpop.f32.mrb[5].mxu1 }
 0x391   : > { %v930_v29 = vpop.f32.mrb[6].mxu1 }
 0x392   : > { %v2505_v30 = vpop.f32.mrb[7].mxu1  ;;  %v1072_v31 = vsel %vm1071_vm5, %v928_v27, -inf }
 0x393   : > { %1073 = vmax.xlane.f32.xlu1 %v1072_v31 }
 0x402   : > { %v973_v32 = vpop.f32.mrb[8].mxu1 }
 0x403   : > { %v974_v33 = vadd.f32 %v2309_v25, %v973_v32  ;;  %v2510_v34 = vpop.f32.mrb[9].mxu1 }
 0x404   : > { %v976_v35 = vpop.f32.mrb[10].mxu1 }
 0x405   : > { %v2511_v36 = vpop.f32.mrb[11].mxu1  ;;  %v1075_v37 = vsel %vm1071_vm5, %v974_v33, -inf }
 0x406   : > { %1076 = vmax.xlane.f32.xlu0 %v1075_v37 }
 0x40a   : > { %v1019_v38 = vpop.f32.mrb[12].mxu1 }
 0x40b   : > { %v1020_v39 = vadd.f32 %v2309_v25, %v1019_v38  ;;  %v2516_v40 = vpop.f32.mrb[13].mxu1 }
 0x40c   : > { %v1022_v41 = vpop.f32.mrb[14].mxu1 }
 0x40d   : > { %v2517_v42 = vpop.f32.mrb[15].mxu1  ;;  %v1078_v43 = vsel %vm1071_vm5, %v1020_v39, -inf }
 0x40e   : > { %1079 = vmax.xlane.f32.xlu1 %v1078_v43  ;;  %v2689_v42 = vld [vmem:[%s3542_s6] sm:$0xff]   ;;  %v2690_v43 = vld [vmem:[%s3542_s6 + $0x8] sm:$0xff]  }
 0x412   : > { %v1065_v44 = vpop.f32.mrb[16].mxu1 }
 0x413   : > { %v1066_v45 = vadd.f32 %v2309_v25, %v1065_v44  ;;  %v2522_v46 = vpop.f32.mrb[17].mxu1  ;;  %v2691_v44 = vld [vmem:[%s3542_s6 + $0x10] sm:$0xff]  }
 0x414   : > { %v1068_v49 = vpop.f32.mrb[18].mxu1 }
 0x415   : > { %v2523_v51 = vpop.f32.mrb[19].mxu1  ;;  %v1081_v53 = vsel %vm1071_vm5, %v1066_v45, -inf }
 0x416   : > { %1082 = vmax.xlane.f32.xlu1 %v1081_v53  ;;  %v2692_v53 = vld [vmem:[%s3542_s6 + $0x18] sm:$0xff]  }
 0x420   : > { %v1074_v54 = vpop.xlane.xlu1 %1073 }
 0x421   : > { %v1084_v55 = vsub.f32 %v928_v27, %v1074_v54 }
 0x423   : > { %v1088_v57 = vmul.f32 1.442695, %v1084_v55 }
 0x425   : > { %2781 = vpow2.f32 %v1088_v57 }
 0x42f   : > { %v2782_v58 = vpop.eup %2781 }
 0x430   : > { %v1096_v59 = vsel %vm1071_vm5, %v2782_v58, 0.0 }
 0x431   : > { %1097 = vadd.xlane.f32.xlu0 %v1096_v59 }
 0x493   : > { %v1077_v60 = vpop.xlane.xlu0 %1076 }
 0x494   : > { %v1085_v61 = vsub.f32 %v974_v33, %v1077_v60  ;;  %v2694_v60 = vld [vmem:[%s3542_s6 + $0x28] sm:$0xff]  }
 0x496   : > { %v1090_v62 = vmul.f32 1.442695, %v1085_v61  ;;  %v2695_v61 = vld [vmem:[%s3542_s6 + $0x30] sm:$0xff]  }
 0x498   : > { %2783 = vpow2.f32 %v1090_v62  ;;  %v2696_v62 = vld [vmem:[%s3542_s6 + $0x38] sm:$0xff]  }
 0x49b   : > { %v1080_v63 = vpop.xlane.xlu1 %1079 }
 0x49c   : > { %v1086_v1 = vsub.f32 %v1020_v39, %v1080_v63 }
 0x49e   : > { %v1092_v2 = vmul.f32 1.442695, %v1086_v1 }
 0x4a0   : > { %2785 = vpow2.f32 %v1092_v2 }
 0x4a2   : > { %v2784_v3 = vpop.eup %2783 }
 0x4a3   : > { %v1099_v4 = vsel %vm1071_vm5, %v2784_v3, 0.0  ;;  %v1083_v9 = vpop.xlane.xlu1 %1082 }
 0x4a4   : > { %1100 = vadd.xlane.f32.xlu1 %v1099_v4  ;;  %v1087_v10 = vsub.f32 %v1066_v45, %v1083_v9 }
 0x4a6   : > { %v1094_v11 = vmul.f32 1.442695, %v1087_v10 }
 0x4aa   : > { %v2786_v5 = vpop.eup %2785 }
 0x4ab   : > { %v1102_v6 = vsel %vm1071_vm5, %v2786_v5, 0.0 }
 0x4ac   : > { %1103 = vadd.xlane.f32.xlu0 %v1102_v6 }
 0x4b5   : > { %869 = vrot.lane.b32.xlu1 %v3348_v56, %s3020_s25 }
 0x4be   : > { %v1098_v7 = vpop.xlane.xlu0 %1097 }
 0x4bf   : > { %2787 = vrcp.f32 %v1098_v7 }
 0x4c0   : > { %2789 = vpow2.f32 %v1094_v11  ;;  %v2318_v11 = vld [vmem:[%s3543_s7] ss:$0 sm:$0xff] }
 0x4c2   : > { %866 = vrot.lane.b32.xlu0 %v3348_v56, %s3021_s24 }
 0x4c9   : > { %v2788_v12 = vpop.eup %2787 }
 0x4ca   : > { %v1112_v13 = vmul.f32 %v2788_v12, %v2782_v58  ;;  %v2790_v15 = vpop.eup %2789  ;;  %v2693_v58 = vld [vmem:[%s3542_s6 + $0x20] sm:$0xff]  }
 0x4cb   : > { %v1105_v16 = vsel %vm1071_vm5, %v2790_v15, 0.0 }
 0x4cc   : > { %v1116_v14 = vpack.c.bf16 %v1112_v13, %v1112_v13 }
 0x4ce   : > { %2527 = vmatmul.mubr.msk.bf16.vlgmr.msra.gmra.mrb[4].mxu0 %vm1071_vm5, %v1116_v14 }
 0x4cf   : > { %2538 = vmatprep.mubr.msk.bf16.mxu0 %vm3019_vm0, %v3017_v8 }
 0x4d9   : > { %1106 = vadd.xlane.f32.xlu1 %v1105_v16 }
 0x4ea   : > { %872 = vrot.lane.b32.xlu1 %v3348_v56, %s3022_s20 }
 0x531   : > { %v1101_v17 = vpop.xlane.xlu1 %1100 }
 0x532   : > { %2791 = vrcp.f32 %v1101_v17 }
 0x535   : > { %v870_v18 = vpop.permute.xlu1 %869 }
 0x536   : > { %v877_v19 = vpack.c.bf16 %v870_v18, %v870_v18 }
 0x538   : > { %v1217_v20 = vsel %vm1123_vm3, %v877_v19, 0 }
 0x539   : > { %v1104_v21 = vpop.xlane.xlu0 %1103  ;;  %2537 = vmatpush3.bf16.msra.mxu0 %v1217_v20 }
 0x53a   : > { %2793 = vrcp.f32 %v1104_v21  ;;  %2548 = vmatprep.subr.bf16.mxu0 %v3017_v8  ;;  %v2699_v21 = vld [vmem:[#allocation7 + $0x4] ss:$16 sps:$4 sm:$0xff]  }
 0x53c   : > { %v2792_v23 = vpop.eup %2791 }
 0x53d   : > { %v867_v24 = vpop.permute.xlu0 %866  ;;  %v1113_v25 = vmul.f32 %v2792_v23, %v2784_v3  ;;  %v2702_v23 = vld [vmem:[#allocation7 + $0xc] ss:$16 sps:$4 sm:$0xff]  }
 0x53e   : > { %v876_v26 = vpack.c.bf16 %v867_v24, %v867_v24  ;;  %v2697_v24 = vld [vmem:[#allocation7] ss:$16 sps:$4 sm:$0xff]  }
 0x53f   : > { %v1117_v28 = vpack.c.bf16 %v1113_v25, %v1113_v25  ;;  %v2700_v25 = vld [vmem:[#allocation7 + $0x8] ss:$16 sps:$4 sm:$0xff]  }
 0x540   : > { %v1171_v27 = vsel %vm1123_vm3, %v876_v26, 0  ;;  %v2708_v26 = vld [vmem:[#allocation7 + $0x2c] ss:$16 sps:$4 sm:$0xff]  }
 0x541   : > { %2531 = vmatpush3.bf16.msra.mxu1 %v1171_v27  ;;  %v2703_v27 = vld [vmem:[#allocation7 + $0x20] ss:$16 sps:$4 sm:$0xff]  }
 0x542   : > { %2542 = vmatprep.subr.bf16.mxu1 %v3017_v8 }
 0x544   : > { %v2794_v56 = vpop.eup %2793  ;;  %2533 = vmatmul.mubr.msk.bf16.vlgmr.msra.gmra.mrb[20].mxu1 %vm1071_vm5, %v1117_v28  ;;  %v2706_v28 = vld [vmem:[#allocation7 + $0x28] ss:$16 sps:$4 sm:$0xff]  }
 0x545   : > { %v1114_v29 = vmul.f32 %v2794_v56, %v2786_v5  ;;  %2544 = vmatprep.mubr.msk.bf16.mxu1 %vm3019_vm0, %v3017_v8  ;;  %v2711_v56 = vld [vmem:[#allocation7 + $0x44] ss:$16 sps:$4 sm:$0xff]  }
 0x547   : > { %v1118_v30 = vpack.c.bf16 %v1114_v29, %v1114_v29  ;;  %v2714_v29 = vld [vmem:[#allocation7 + $0x4c] ss:$16 sps:$4 sm:$0xff]  }
 0x549   : > { %2539 = vmatmul.mubr.msk.bf16.vlgmr.msra.gmra.mrb[8].mxu0 %vm1071_vm5, %v1118_v30  ;;  %v2709_v30 = vld [vmem:[#allocation7 + $0x40] ss:$16 sps:$4 sm:$0xff]  }
 0x54a   : > { %2564 = vmatprep.mubr.msk.bf16.mxu0 %vm3019_vm0, %v3017_v8  ;;  %2549 = vmatpush3.bf16.msra.mxu0 %v2689_v42  ;;  %v2727_v42 = vld [vmem:[#allocation7 + $0xa0] ss:$16 sps:$4 sm:$0xff]  }
 0x54b   : > { %2550 = vmatprep.subr.bf16.mxu0 %v3017_v8 }
 0x54e   : > { %2551 = vmatpush3.bf16.msra.mxu0 %v2690_v43  ;;  %v2730_v43 = vld [vmem:[#allocation7 + $0xa8] ss:$16 sps:$4 sm:$0xff]  }
 0x54f   : > { %2552 = vmatprep.subr.bf16.mxu0 %v3017_v8 }
 0x552   : > { %2553 = vmatpush3.bf16.msra.mxu0 %v2691_v44  ;;  %v2735_v44 = vld [vmem:[#allocation7 + $0xc4] ss:$16 sps:$4 sm:$0xff]  }
 0x553   : > { %2554 = vmatprep.subr.bf16.mxu0 %v3017_v8 }
 0x556   : > { %2555 = vmatpush3.bf16.msra.mxu0 %v2692_v53  ;;  %v2744_v53 = vld [vmem:[#allocation7 + $0xec] ss:$16 sps:$4 sm:$0xff]  }
 0x557   : > { %2556 = vmatprep.subr.bf16.mxu0 %v3017_v8 }
 0x55a   : > { %2557 = vmatpush3.bf16.msra.mxu0 %v2693_v58 }
 0x55b   : > { %2558 = vmatprep.subr.bf16.mxu0 %v3017_v8 }
 0x55e   : > { %2559 = vmatpush3.bf16.msra.mxu0 %v2694_v60 }
 0x55f   : > { %2560 = vmatprep.subr.bf16.mxu0 %v3017_v8 }
 0x562   : > { %2561 = vmatpush3.bf16.msra.mxu0 %v2695_v61 }
 0x563   : > { %2562 = vmatprep.subr.bf16.mxu0 %v3017_v8 }
 0x566   : > { %v1107_v31 = vpop.xlane.xlu1 %1106  ;;  %2563 = vmatpush3.bf16.msra.mxu0 %v2696_v62 }
 0x567   : > { %2795 = vrcp.f32 %v1107_v31  ;;  %1725 = vmatprep.subr.bf16.mxu0 %v2702_v23  ;;  %v2712_v31 = vld [vmem:[#allocation7 + $0x48] ss:$16 sps:$4 sm:$0xff]  }
 0x568   : > { %v2758_v23 = vld [vmem:[#allocation8 + $0xd8] sm:$0xff]  }
 0x56a   : > { %v873_v32 = vpop.permute.xlu1 %872 }
 0x56b   : > { %v878_v33 = vpack.c.bf16 %v873_v32, %v873_v32  ;;  %v2717_v32 = vld [vmem:[#allocation7 + $0x64] ss:$16 sps:$4 sm:$0xff]  }
 0x56d   : > { %v1263_v34 = vsel %vm1123_vm3, %v878_v33, 0  ;;  %v2720_v33 = vld [vmem:[#allocation7 + $0x6c] ss:$16 sps:$4 sm:$0xff]  }
 0x56e   : > { %2543 = vmatpush3.bf16.msra.mxu1 %v1263_v34  ;;  %v2715_v34 = vld [vmem:[#allocation7 + $0x60] ss:$16 sps:$4 sm:$0xff]  }
 0x56f   : > { %1684 = vmatprep.subr.bf16.mxu1 %v2699_v21  ;;  %v2757_v21 = vld [vmem:[#allocation8 + $0x58] sm:$0xff]  }
 0x571   : > { %v2796_v35 = vpop.eup %2795 }
 0x572   : > { %v1115_v36 = vmul.f32 %v2796_v35, %v2790_v15  ;;  %v2718_v35 = vld [vmem:[#allocation7 + $0x68] ss:$16 sps:$4 sm:$0xff]  }
 0x574   : > { %v1119_v37 = vpack.c.bf16 %v1115_v36, %v1115_v36  ;;  %v2721_v36 = vld [vmem:[#allocation7 + $0x80] ss:$16 sps:$4 sm:$0xff]  }
 0x576   : > { %2545 = vmatmul.mubr.msk.bf16.vlgmr.msra.gmra.mrb[24].mxu1 %vm1071_vm5, %v1119_v37  ;;  %v2723_v37 = vld [vmem:[#allocation7 + $0x84] ss:$16 sps:$4 sm:$0xff]  }
 0x577   : > { %1716 = vmatprep.mubr.bf16.mxu1 %v3018_v22  ;;  %1685 = vmatpush1.bf16.msra.mxu1 %v2697_v24  ;;  %v2759_v24 = vld [vmem:[#allocation8 + $0x18] sm:$0xff]  }
 0x5a1   : > { %v1161_v38 = vpop.f32.mrb[4].mxu0 }
 0x5a2   : > { %v2528_v39 = vpop.f32.mrb[5].mxu0 }
 0x5a3   : > { %v1164_v40 = vpop.f32.mrb[6].mxu0  ;;  %v2726_v39 = vld [vmem:[#allocation7 + $0x8c] ss:$16 sps:$4 sm:$0xff]  }
 0x5a4   : > { %v2529_v41 = vpop.f32.mrb[7].mxu0  ;;  %v2729_v40 = vld [vmem:[#allocation7 + $0xa4] ss:$16 sps:$4 sm:$0xff]  }
 0x5a5   : > { %v2732_v41 = vld [vmem:[#allocation7 + $0xac] ss:$16 sps:$4 sm:$0xff]  }
 0x617   : > { %v1207_v45 = vpop.f32.mrb[20].mxu1 }
 0x618   : > { %1306 = vrot.lane.b32.xlu0 %v1207_v45, %s3022_s20  ;;  %v2534_v46 = vpop.f32.mrb[21].mxu1  ;;  %v2738_v45 = vld [vmem:[#allocation7 + $0xcc] ss:$16 sps:$4 sm:$0xff]   ;;  %s3581_s20 = sld [smem:[#allocation19_spill]] }
 0x619   : > { %v1210_v49 = vpop.f32.mrb[22].mxu1  ;;  %v2733_v46 = vld [vmem:[#allocation7 + $0xc0] ss:$16 sps:$4 sm:$0xff]  }
 0x61a   : > { %v2535_v51 = vpop.f32.mrb[23].mxu1  ;;  %v2736_v49 = vld [vmem:[#allocation7 + $0xc8] ss:$16 sps:$4 sm:$0xff]  }
 0x61b   : > { %v2741_v51 = vld [vmem:[#allocation7 + $0xe4] ss:$16 sps:$4 sm:$0xff]  }
 0x61c   : > { %v1253_v54 = vpop.f32.mrb[8].mxu0 }
 0x61d   : > { %1310 = vrot.lane.b32.xlu1 %v1253_v54, %s3020_s25  ;;  %v2540_v55 = vpop.f32.mrb[9].mxu0  ;;  %v2739_v54 = vld [vmem:[#allocation7 + $0xe0] ss:$16 sps:$4 sm:$0xff]   ;;  %s3582_s25 = sld [smem:[#allocation20_spill]] }
 0x61e   : > { %v1256_v57 = vpop.f32.mrb[10].mxu0  ;;  %v2742_v55 = vld [vmem:[#allocation7 + $0xe8] ss:$16 sps:$4 sm:$0xff]  }
 0x61f   : > { %v2541_v59 = vpop.f32.mrb[11].mxu0 }
 0x649   : > { %v1299_v63 = vpop.f32.mrb[24].mxu1 }
 0x64a   : > { %1314 = vrot.lane.b32.xlu0 %v1299_v63, %s3021_s24  ;;  %v2546_v1 = vpop.f32.mrb[25].mxu1  ;;  %s537_s24 = scalar_lea.vmem [#allocation10], %s2278_s27  ;;  %s2935_s27 = sshll.u32 %s3023_s17, 4  ;;  %s2936_s27 = int_to_ptr.vmem [resolvable:$false] %s2935_s27 }
 0x64b   : > { %v1302_v2 = vpop.f32.mrb[26].mxu1  ;;  %s2161_s26 = sshll.u32 %s537_s24, 4  ;;  %s3494_s26 = int_to_ptr.vmem [resolvable:$true] %s2161_s26 }
 0x64c   : > { %v2547_v3 = vpop.f32.mrb[27].mxu1  ;;  %s2931_s21 = scalar_lea.vmem %s3494_s26, 128  ;;  %p2938_p2 = scmp.lt.s32.totalorder %s3494_s26, %s2936_s27 }
 0x64d   : > { %v2327_v3 = vld [vmem:[%s3580_s13] ss:$0 sm:$0xff]  ;;  %p2932_p3 = scmp.ne.s32.totalorder %s3494_s26, %s2931_s21 }
 0x64f   : > { %p2933_p7 = pnand %p2932_p3, %p3241_p5 }
 0x651   : > { %p2934_p12 = pneg %p2933_p7 }
 0x68a   : > { %v1307_v4 = vpop.permute.xlu0 %1306 }
 0x68b   : > { %v1317_v6 = vsel %vm886_vm4, %v1161_v38, %v1307_v4  ;;  %v2724_v38 = vld [vmem:[#allocation7 + $0x88] ss:$16 sps:$4 sm:$0xff]  }
 0x68f   : > { %v1311_v5 = vpop.permute.xlu1 %1310 }
 0x690   : > { %v1319_v7 = vsel %vm1318_vm6, %v1317_v6, %v1311_v5  ;;  %v2328_v5 = vld [vmem:[%s3581_s20] ss:$0 sm:$0xff]  ;;  %s3492_s20 = scalar_lea.hbm %s3584_s14, %s2399_s29 }
 0x6bc   : > { %v1315_v9 = vpop.permute.xlu0 %1314 }
 0x6bd   : > { %v1321_v8 = vsel %vm1320_vm7, %v1319_v7, %v1315_v9 }
 0x6be   : > { %v1322_v10 = vpack.c.bf16 %v1321_v8, %v1321_v8  ;;  %v2745_v8 = vld [vmem:[#allocation8 + $0x40] sm:$0xff]  }
 0x6c0   : > { %2565 = vmatmul.mubr.bf16.vlgmr.msra.gmra.mrb[12].mxu0 %v1322_v10  ;;  %v2746_v10 = vld [vmem:[#allocation8 + $0xc0] sm:$0xff]  }
 0x6c1   : > { %1757 = vmatprep.mubr.bf16.mxu0 %v3018_v22  ;;  %1726 = vmatpush1.bf16.msra.mxu0 %v2700_v25  ;;  %v2760_v25 = vld [vmem:[#allocation8 + $0x98] sm:$0xff]  }
 0x6c2   : > { %1727 = vmatprep.subr.bf16.mxu0 %v2708_v26  ;;  %v2762_v26 = vld [vmem:[#allocation8 + $0xe0] sm:$0xff]  }
 0x6c5   : > { %1728 = vmatpush1.bf16.msra.mxu0 %v2706_v28  ;;  %v2764_v28 = vld [vmem:[#allocation8 + $0xa0] sm:$0xff]  }
 0x6c6   : > { %1729 = vmatprep.subr.bf16.mxu0 %v2714_v29  ;;  %v2766_v29 = vld [vmem:[#allocation8 + $0xe8] sm:$0xff]  }
 0x6c9   : > { %1730 = vmatpush1.bf16.msra.mxu0 %v2712_v31  ;;  %v2768_v31 = vld [vmem:[#allocation8 + $0xa8] sm:$0xff]  }
 0x6ca   : > { %1731 = vmatprep.subr.bf16.mxu0 %v2720_v33  ;;  %v2770_v33 = vld [vmem:[#allocation8 + $0xf0] sm:$0xff]  }
 0x6cd   : > { %1732 = vmatpush1.bf16.msra.mxu0 %v2718_v35  ;;  %v2772_v35 = vld [vmem:[#allocation8 + $0xb0] sm:$0xff]  }
 0x6ce   : > { %1733 = vmatprep.subr.bf16.mxu0 %v2726_v39  ;;  %v2776_v39 = vld [vmem:[#allocation8 + $0xb8] sm:$0xff]  }
 0x6d1   : > { %1734 = vmatpush1.bf16.msra.mxu0 %v2724_v38  ;;  %v2775_v38 = vld [vmem:[#allocation8 + $0x38] sm:$0xff]  }
 0x6d2   : > { %1735 = vmatprep.subr.bf16.mxu0 %v2732_v41  ;;  %v1518_v41 = vsub.s32 3, %v3336_v47 }
 0x6d5   : > { %1736 = vmatpush1.bf16.msra.mxu0 %v2730_v43 }
 0x6d6   : > { %1737 = vmatprep.subr.bf16.mxu0 %v2738_v45 }
 0x6d9   : > { %1738 = vmatpush1.bf16.msra.mxu0 %v2736_v49 }
 0x6da   : > { %1739 = vmatprep.subr.bf16.mxu0 %v2744_v53 }
 0x6dd   : > { %1740 = vmatpush1.bf16.msra.mxu0 %v2742_v55 }
 0x6de   : > { %2458 = vmatprep.subr.bf16.mxu0 %v2746_v10 }
 0x793   : > { %v1428_v12 = vpop.f32.mrb[12].mxu0 }
 0x794   : > { %v1429_v13 = vadd.f32 %v2318_v11, %v1428_v12  ;;  %v2566_v14 = vpop.f32.mrb[13].mxu0  ;;  %v2747_v11 = vld [vmem:[#allocation8] sm:$0xff]  }
 0x795   : > { %v1431_v15 = vpop.f32.mrb[14].mxu0  ;;  %v2748_v12 = vld [vmem:[#allocation8 + $0x80] sm:$0xff]   ;;  %v2750_v14 = vld [vmem:[#allocation8 + $0xc8] sm:$0xff]  }
 0x796   : > { %v3457_v16 = vadd.f32 %v1429_v13, %v3304_v0  ;;  %v2567_v17 = vpop.f32.mrb[15].mxu0  ;;  %v2705_v0 = vld [vmem:[#allocation7 + $0x24] ss:$16 sps:$4 sm:$0xff]   ;;  %v2749_v13 = vld [vmem:[#allocation8 + $0x48] sm:$0xff]  }
 0x797   : > { %1686 = vmatprep.subr.bf16.mxu1 %v2705_v0  ;;  %v2751_v15 = vld [vmem:[#allocation8 + $0x8] sm:$0xff]   ;;  %v2761_v0 = vld [vmem:[#allocation8 + $0x60] sm:$0xff]  }
 0x798   : > { %1437 = vadd.xlane.f32.xlu1 %v3457_v16  ;;  %1687 = vmatpush1.bf16.msra.mxu1 %v2703_v27  ;;  %v2752_v17 = vld [vmem:[#allocation8 + $0x88] sm:$0xff]   ;;  %v2763_v27 = vld [vmem:[#allocation8 + $0x20] sm:$0xff]  }
 0x799   : > { %1688 = vmatprep.subr.bf16.mxu1 %v2711_v56  ;;  %v2765_v56 = vld [vmem:[#allocation8 + $0x68] sm:$0xff]  }
 0x79c   : > { %1689 = vmatpush1.bf16.msra.mxu1 %v2709_v30  ;;  %v2767_v30 = vld [vmem:[#allocation8 + $0x28] sm:$0xff]  }
 0x79d   : > { %1690 = vmatprep.subr.bf16.mxu1 %v2717_v32  ;;  %v2769_v32 = vld [vmem:[#allocation8 + $0x70] sm:$0xff]  }
 0x7a0   : > { %1691 = vmatpush1.bf16.msra.mxu1 %v2715_v34  ;;  %v2771_v34 = vld [vmem:[#allocation8 + $0x30] sm:$0xff]  }
 0x7a1   : > { %1692 = vmatprep.subr.bf16.mxu1 %v2723_v37  ;;  %v2774_v37 = vld [vmem:[#allocation8 + $0xf8] sm:$0xff]  }
 0x7a4   : > { %1693 = vmatpush1.bf16.msra.mxu1 %v2721_v36  ;;  %v2773_v36 = vld [vmem:[#allocation8 + $0x78] sm:$0xff]  }
 0x7a5   : > { %1694 = vmatprep.subr.bf16.mxu1 %v2729_v40  ;;  %v1502_v40 = vld [vmem:[%s3582_s25] sm:$0xf]  ;;  %s2937_s25 = scalar_lea.vmem %s2936_s27, 256 }
 0x7a6   : > { %v1515_v43 = vrot.slane %v1502_v40, %v623_v48  ;;  %v1519_v45 = vrot.slane %v1502_v40, %v1518_v41  ;;  %p2939_p1 = scmp.lt.s32.totalorder %s2937_s25, %s2931_s21 }
 0x7a8   : > { %1695 = vmatpush1.bf16.msra.mxu1 %v2727_v42  ;;  %v1507_v42 = vrot.slane %v1502_v40, %v615_v52  ;;  %p2940_p4 = por %p2939_p1, %p2938_p2 }
 0x7a9   : > { %1696 = vmatprep.subr.bf16.mxu1 %v2735_v44  ;;  %v1511_v44 = vrot.slane %v1502_v40, %v619_v50 }
 0x7aa   : > { %p2941_p0 = pnand %p2940_p4, %p2934_p12 }
 0x7ac   : > { %1697 = vmatpush1.bf16.msra.mxu1 %v2733_v46 }
 0x7ad   : > { %1698 = vmatprep.subr.bf16.mxu1 %v2741_v51 }
 0x7b0   : > { %1699 = vmatpush1.bf16.msra.mxu1 %v2739_v54 }
 0x7b1   : > { %2436 = vmatprep.subr.bf16.mxu1 %v2745_v8 }
 0x825   : > { %v1438_v18 = vpop.xlane.xlu1 %1437 }
 0x826   : > { %v1439_v19 = vmul.f32 0.0078125, %v1438_v18  ;;  %v2753_v18 = vld [vmem:[#allocation8 + $0x50] sm:$0xff]  }
 0x828   : > { %v3461_v20 = vsub.f32 %v3457_v16, %v1439_v19  ;;  %v2754_v19 = vld [vmem:[#allocation8 + $0xd0] sm:$0xff]  }
 0x82a   : > { %v1441_v22 = vmul.f32 %v3461_v20, %v3461_v20 }
 0x82c   : > { %1442 = vadd.xlane.f32.xlu0 %v1441_v22  ;;  %v2756_v22 = vld [vmem:[#allocation8 + $0x90] sm:$0xff]  }
 0x8b9   : > { %v1443_v57 = vpop.xlane.xlu0 %1442 }
 0x8ba   : > { %v1444_v58 = vmul.f32 0.0078125, %v1443_v57 }
 0x8bc   : > { %v1445_v59 = vadd.f32 1e-12, %v1444_v58 }
 0x8be   : > { %2797 = vrsqrt.f32 %v1445_v59  ;;  %vm1448_vm8 = vcmp.eq.f32.partialorder %v1445_v59, inf  ;;  %v1451_v62 = vand.u32 2147483648, %v1445_v59  ;;  %vm1450_vm9 = vcmp.eq.f32.partialorder %v1445_v59, 0.0 }
 0x8c8   : > { %v2798_v60 = vpop.eup %2797 }
 0x8c9   : > { %v1447_v61 = vmul.f32 %v2798_v60, %v1445_v59 }
 0x8cb   : > { %v1449_v63 = vsel %vm1448_vm8, %v1445_v59, %v1447_v61 }
 0x8cc   : > { %v1452_v1 = vsel %vm1450_vm9, %v1451_v62, %v1449_v63 }
 0x8cd   : > { %2799 = vrcp.f32 %v1452_v1 }
 0x8d7   : > { %v2800_v2 = vpop.eup %2799 }
 0x8d8   : > { %v1454_v4 = vmul.f32 %v2800_v2, %v3461_v20  ;;  %v2755_v20 = vld [vmem:[#allocation8 + $0x10] sm:$0xff]  }
 0x8da   : > { %v1461_v6 = vmul.f32 %v2327_v3, %v1454_v4 }
 0x8dc   : > { %v1468_v7 = vadd.f32 %v2328_v5, %v1461_v6 }
 0x8de   : > { %v1469_v9 = vpack.c.bf16 %v1468_v7, %v1468_v7 }
 0x8e0   : > { %1717 = vmatmul.mubr.bf16.vlgmr.msra.gmra.mrb[28].mxu1 %v1469_v9  ;;  %1758 = vmatmul.mubr.bf16.vlgmr.msra.gmra.mrb[16].mxu0 %v1469_v9 }
 0x8e1   : > { %2437 = vmatpush3.bf16.msra.mxu1 %v2747_v11  ;;  %2459 = vmatpush3.bf16.msra.mxu0 %v2748_v12 }
 0x8e2   : > { %2438 = vmatprep.subr.bf16.mxu1 %v2749_v13  ;;  %2460 = vmatprep.subr.bf16.mxu0 %v2750_v14 }
 0x8e5   : > { %2439 = vmatpush3.bf16.msra.mxu1 %v2751_v15  ;;  %2461 = vmatpush3.bf16.msra.mxu0 %v2752_v17 }
 0x8e6   : > { %2440 = vmatprep.subr.bf16.mxu1 %v2753_v18  ;;  %2462 = vmatprep.subr.bf16.mxu0 %v2754_v19 }
 0x8e9   : > { %2441 = vmatpush3.bf16.msra.mxu1 %v2755_v20  ;;  %2463 = vmatpush3.bf16.msra.mxu0 %v2756_v22 }
 0x8ea   : > { %2442 = vmatprep.subr.bf16.mxu1 %v2757_v21  ;;  %2464 = vmatprep.subr.bf16.mxu0 %v2758_v23 }
 0x8ed   : > { %2443 = vmatpush3.bf16.msra.mxu1 %v2759_v24  ;;  %2465 = vmatpush3.bf16.msra.mxu0 %v2760_v25 }
 0x8ee   : > { %2444 = vmatprep.subr.bf16.mxu1 %v2761_v0  ;;  %2466 = vmatprep.subr.bf16.mxu0 %v2762_v26  ;;  %v2365_v26 = vld [vmem:[%s3583_s4] ss:$0 sm:$0xff] }
 0x8f1   : > { %2445 = vmatpush3.bf16.msra.mxu1 %v2763_v27  ;;  %2467 = vmatpush3.bf16.msra.mxu0 %v2764_v28 }
 0x8f2   : > { %2446 = vmatprep.subr.bf16.mxu1 %v2765_v56  ;;  %2468 = vmatprep.subr.bf16.mxu0 %v2766_v29 }
 0x8f5   : > { %2447 = vmatpush3.bf16.msra.mxu1 %v2767_v30  ;;  %2469 = vmatpush3.bf16.msra.mxu0 %v2768_v31 }
 0x8f6   : > { %2448 = vmatprep.subr.bf16.mxu1 %v2769_v32  ;;  %2470 = vmatprep.subr.bf16.mxu0 %v2770_v33 }
 0x8f9   : > { %2449 = vmatpush3.bf16.msra.mxu1 %v2771_v34  ;;  %2471 = vmatpush3.bf16.msra.mxu0 %v2772_v35 }
 0x8fa   : > { %2450 = vmatprep.subr.bf16.mxu1 %v2773_v36  ;;  %2472 = vmatprep.subr.bf16.mxu0 %v2774_v37 }
 0x8fd   : > { %2451 = vmatpush3.bf16.msra.mxu1 %v2775_v38  ;;  %2473 = vmatpush3.bf16.msra.mxu0 %v2776_v39 }
 0x9b3   : > { %v1718_v46 = vpop.f32.mrb[28].mxu1  ;;  %v1759_v49 = vpop.f32.mrb[16].mxu0 }
 0x9b4   : > { %v1719_v51 = vadd.f32 %v1718_v46, %v1507_v42  ;;  %v1760_v53 = vadd.f32 %v1759_v49, %v1515_v43  ;;  %v1720_v54 = vpop.f32.mrb[29].mxu1  ;;  %v1761_v55 = vpop.f32.mrb[17].mxu0 }
 0x9b5   : > { %v1721_v57 = vadd.f32 %v1720_v54, %v1511_v44  ;;  %v1762_v58 = vadd.f32 %v1761_v55, %v1519_v45  ;;  %v1722_v59 = vpop.f32.mrb[30].mxu1  ;;  %v1763_v60 = vpop.f32.mrb[18].mxu0 }
 0x9b6   : > { %v2361_v61 = vmul.f32 -1.702, %v1719_v51  ;;  %v2363_v62 = vmul.f32 -1.702, %v1760_v53  ;;  %v1723_v52 = vpop.f32.mrb[31].mxu1  ;;  %v1764_v63 = vpop.f32.mrb[19].mxu0 }
 0x9b7   : > { %v2362_v1 = vmul.f32 -1.702, %v1721_v57  ;;  %v2364_v48 = vmul.f32 -1.702, %v1762_v58 }
 0x9b8   : > { %v1774_v2 = vmul.f32 1.442695, %v2361_v61  ;;  %v1778_v47 = vmul.f32 1.442695, %v2363_v62 }
 0x9b9   : > { %v1776_v50 = vmul.f32 1.442695, %v2362_v1  ;;  %v1780_v3 = vmul.f32 1.442695, %v2364_v48 }
 0x9ba   : > { %2801 = vpow2.f32 %v1774_v2 }
 0x9bb   : > { %2803 = vpow2.f32 %v1778_v47 }
 0x9bc   : > { %2805 = vpow2.f32 %v1776_v50 }
 0x9bd   : > { %2807 = vpow2.f32 %v1780_v3 }
 0x9c4   : > { %v2802_v4 = vpop.eup %2801 }
 0x9c5   : > { %v2804_v5 = vpop.eup %2803  ;;  %v1782_v6 = vadd.f32 1.0, %v2802_v4 }
 0x9c6   : > { %v2806_v7 = vpop.eup %2805  ;;  %v1784_v9 = vadd.f32 1.0, %v2804_v5 }
 0x9c7   : > { %v2808_v8 = vpop.eup %2807  ;;  %2809 = vrcp.f32 %v1782_v6  ;;  %v1783_v10 = vadd.f32 1.0, %v2806_v7 }
 0x9c8   : > { %2811 = vrcp.f32 %v1784_v9  ;;  %v1785_v11 = vadd.f32 1.0, %v2808_v8 }
 0x9c9   : > { %2813 = vrcp.f32 %v1783_v10 }
 0x9ca   : > { %2815 = vrcp.f32 %v1785_v11 }
 0x9d1   : > { %v2810_v12 = vpop.eup %2809 }
 0x9d2   : > { %v2812_v13 = vpop.eup %2811  ;;  %v1794_v15 = vmul.f32 %v2810_v12, %v1719_v51 }
 0x9d3   : > { %v2814_v14 = vpop.eup %2813  ;;  %v1796_v18 = vmul.f32 %v2812_v13, %v1760_v53 }
 0x9d4   : > { %v2816_v17 = vpop.eup %2815  ;;  %v1795_v19 = vmul.f32 %v2814_v14, %v1721_v57  ;;  %v1798_v21 = vpack.c.bf16 %v1794_v15, %v1794_v15 }
 0x9d5   : > { %v1797_v20 = vmul.f32 %v2816_v17, %v1762_v58  ;;  %v1800_v24 = vpack.c.bf16 %v1796_v18, %v1796_v18 }
 0x9d6   : > { %v1799_v22 = vpack.c.bf16 %v1795_v19, %v1795_v19 }
 0x9d7   : > { %v1801_v23 = vpack.c.bf16 %v1797_v20, %v1797_v20 }
 0x9d8   : > { %2097 = vmatprep.mubr.bf16.mxu1 %v1799_v22 }
 0x9d9   : > { %2137 = vmatprep.mubr.bf16.mxu0 %v1801_v23  ;;  %2098 = vmatmul.mubr.bf16.vlgmr.msra.gmra.mrb[32].mxu1 %v1798_v21 }
 0x9da   : > { %2138 = vmatmul.mubr.bf16.vlgmr.msra.gmra.mrb[20].mxu0 %v1800_v24 }
 0xaac   : > { %v2452_v25 = vpop.f32.mrb[32].mxu1 }
 0xaad   : > { %v2474_v0 = vpop.f32.mrb[20].mxu0  ;;  %v2453_v27 = vpop.f32.mrb[33].mxu1 }
 0xaae   : > { %v2454_v28 = vadd.f32 %v2453_v27, %v2452_v25  ;;  %v2475_v56 = vpop.f32.mrb[21].mxu0  ;;  %v2455_v29 = vpop.f32.mrb[34].mxu1 }
 0xaaf   : > { %v2476_v30 = vadd.f32 %v2475_v56, %v2474_v0  ;;  %v2477_v31 = vpop.f32.mrb[22].mxu0  ;;  %v2456_v32 = vpop.f32.mrb[35].mxu1 }
 0xab0   : > { %v2100_v33 = vadd.f32 %v2454_v28, %v2365_v26  ;;  %v2478_v34 = vpop.f32.mrb[23].mxu0 }
 0xab2   : > { %v2140_v35 = vadd.f32 %v2476_v30, %v2100_v33 }
 0xab4   : > { %v2145_v36 = vadd.f32 %v2140_v35, %v3457_v16 }
 0xab6   : > { %2146 = vst [vmem:[%s537_s24] sm:$0xff] %v2145_v36 }
 0xab7   : > { %2944 = shalt.err (!%p2941_p0)
}
 0xab8   : > { %s2945_s8 = scalar_lea.hbm %s3492_s20, 128  ;;  %s2949_s4 = scalar_lea.hbm %s3584_s14, 256 }
 0xab9   : > { %p2946_p9 = scmp.ne.s32.totalorder %s3492_s20, %s2945_s8  ;;  %p2950_p13 = scmp.lt.u32.totalorder %s3492_s20, %s3584_s14 }
 0xaba   : > { %p2951_p6 = scmp.lt.u32.totalorder %s2949_s4, %s2945_s8  ;;  %p2953_p3 = scmp.lt.u32.totalorder %s2945_s8, %s3492_s20 }
 0xabb   : > { %p2947_p11 = pnand %p2946_p9, %p3241_p5 }
 0xabc   : > { %p2952_p10 = por %p2951_p6, %p2950_p13 }
 0xabd   : > { %p2948_p8 = pneg %p2947_p11 }
 0xabe   : > { %p2954_p7 = por %p2953_p3, %p2952_p10 }
 0xac0   : > { %p2955_p12 = pnand %p2954_p7, %p2948_p8 }
 0xac2   : > { %2958 = shalt.err (!%p2955_p12)
}
 0xac3   : > { %2582 = dma.vmem_to_hbm [thread:$0]  (%p3241_p5), %s3494_s26, 128, %s3492_s20, %s2148_s19  }
 0xac4 PF: > { %s3585_s13 = sld [smem:[#allocation15_spill]]  ;;  %s3586_s22 = sld [smem:[#allocation16_spill]] }
 0xac5   : > { %p3588_p1 = scmp.ge.s32.totalorder %s3005_s16, 2 }
 0xaca   : > { %s2173_s21 = sand.u32 1, %s3585_s13   ;;  %p3587_p2 = scmp.ne.s32.totalorder %s3586_s22, 0 }
 0xacb   : > { %s2174_s17 = scalar_lea.sflag [#allocation4], %s2173_s21 }
 0xacc   : > { %p2599_p4 = pnand %p3588_p1, %p3587_p2 }
 0xace   : > { %2988 = dma.done.wait (!%p2599_p4), %s2174_s17, 128  }
 0xacf   : > { %2990 = vsyncadd (!%p2599_p4), %s2174_s17, 4294967168  ;;  %p29_p0 = scmp.ge.s32.totalorder %s3227_s11, 4   ;;  %s3589_s29 = smov %s2997_s30 }
 0xad0   : > { %s3590_s30 = smov %s3001_s15  ;;  %s3591_s15 = smov %s3237_s28 }
 0xad1   : > { %s3592_s16 = smov %s3227_s11  ;;  %31 = sbr.rel (!%p29_p0) target bundleno = 14 (0xe), region = 136 }
 0xad8   :  { %2179 = vsyncpa [#allocation3], 1 }
 0xad9   :  { %2181 = vsyncpa [#allocation3 + $0x1], 1 }
 0xada   :  { %2182 = vsyncpa [#allocation6], 1 }
 0xadb   :  { %2183 = vsyncpa [#allocation9], 1 }
 0xadc   :  { %2184 = vsyncpa [#allocation4], 1 }
 0xadd   :  { %2186 = vsyncpa [#allocation4 + $0x1], 1 }

</bundles_post_ra>
